<compile_context>
chip_gen: v7x
topology: tpu7x:2x2x1
jax: 0.10.0
libtpu: 0.0.40
codegen_flags: <defaults>
</compile_context>

<pallas_src>
import functools

import jax
import jax.numpy as jnp
from jax import lax
from jax.experimental import pallas as pl
from jax.experimental.pallas import tpu as pltpu

NEG_SLOPE = 0.01   # PyTorch LeakyReLU default negative_slope
BN_EPS = 1e-5      # PyTorch BatchNorm1d default eps


# ---------------------------------------------------------------------------
# Kernel helpers
# ---------------------------------------------------------------------------
def _leaky(v, slope):
    return jnp.where(v >= 0.0, v, slope * v)


def _shifted_full(t, s, L):
    """Full-width value y with y[:, l] = t[:, l+s] (0 where l+s outside [0,L)).

    Only used when L % 128 == 0: XLU lane roll + iota edge mask => unmasked,
    full-width value (and a full-width aligned store afterwards).
    """
    col = lax.broadcasted_iota(jnp.int32, t.shape, 1)
    r = pltpu.roll(t, (-s) % L, axis=-1)
    if s > 0:
        return jnp.where(col < L - s, r, 0.0)
    return jnp.where(col >= -s, r, 0.0)


def _fill_im2col(dst_ref, t, ksize, cout, L):
    """dst[(k*cout + c), l] = t[c, l + k - pad], zero outside [0, L).

    No full-slab zero-init: each tap row-block is written exactly once (plus
    at most two tiny boundary-column zero stores on the unaligned fallback).
    """
    pad = (ksize - 1) // 2
    aligned = (L % 128 == 0)
    for k in range(ksize):                         # static unroll over taps
        s = k - pad
        rows = slice(k * cout, (k + 1) * cout)
        if s == 0:
            dst_ref[rows, :] = t.astype(dst_ref.dtype)
        elif aligned:
            dst_ref[rows, :] = _shifted_full(t, s, L).astype(dst_ref.dtype)
        else:
            lo_d, hi_d = max(0, -s), min(L, L - s)      # destination columns
            lo_s, hi_s = max(0, s), min(L, L + s)       # source columns
            dst_ref[rows, lo_d:hi_d] = t[:, lo_s:hi_s].astype(dst_ref.dtype)
            if lo_d > 0:
                dst_ref[rows, 0:lo_d] = jnp.zeros((cout, lo_d), dst_ref.dtype)
            if hi_d < L:
                dst_ref[rows, hi_d:L] = jnp.zeros((cout, L - hi_d), dst_ref.dtype)


def _fill_maxpool3(dst_ref, x, L):
    """dst[:, l] = max(x[:, l-1], x[:, l], x[:, l+1]) with edge clamping
    (equivalent to PyTorch MaxPool1d(kernel_size=3, stride=1, padding=1))."""
    if L % 128 == 0:
        col = lax.broadcasted_iota(jnp.int32, x.shape, 1)
        left = jnp.where(col >= 1, pltpu.roll(x, 1, axis=-1), x)       # x[l-1]
        right = jnp.where(col <= L - 2, pltpu.roll(x, L - 1, axis=-1), x)  # x[l+1]
        dst_ref[...] = jnp.maximum(jnp.maximum(left, x), right).astype(dst_ref.dtype)
    else:
        mid = jnp.maximum(jnp.maximum(x[:, 0:L - 2], x[:, 1:L - 1]), x[:, 2:L])
        dst_ref[:, 1:L - 1] = mid.astype(dst_ref.dtype)
        dst_ref[:, 0:1] = jnp.maximum(x[:, 0:1], x[:, 1:2]).astype(dst_ref.dtype)
        dst_ref[:, L - 1:L] = jnp.maximum(x[:, L - 2:L - 1],
                                          x[:, L - 1:L]).astype(dst_ref.dtype)


# ---------------------------------------------------------------------------
# Kernel
# ---------------------------------------------------------------------------
def _incep_kernel(x_ref, w123_ref, aff123_ref, w2b_ref, aff2_ref,
                  w3b_ref, aff3_ref, w4_ref, aff4_ref,
                  out_ref, col2_ref, col3_ref, pool_ref, *, cout, bblk):
    """Fused IncepModule forward for one block of `bblk` batch elements.

    x_ref:    (B, Cin, L)  input block (native dtype, cast in-kernel)
    w123_ref: (3C, Cin)    bf16, stacked k=1 weights (BN scale pre-folded)
    aff123:   (3C, 2)      f32 [shift, leaky-slope] per row
    w2b_ref:  (C, 3C)      bf16, branch2 k=3 weight (taps + BN scale folded)
    aff2:     (C, 1)       f32 shift
    w3b_ref:  (C, 5C)      bf16, branch3 k=5 weight (taps + BN scale folded)
    aff3:     (C, 3)       f32 [shift_b, scale_c, shift_c]
    w4_ref:   (C, Cin)     bf16, branch4 k=1 weight (BN scale folded)
    aff4:     (C, 1)       f32 shift
    out_ref:  (B, 4C, L)   concatenated output (NCL)
    scratch:  col2 (3C, L) bf16, col3 (5C, L) bf16, pool (Cin, L) bf16
    """
    L = out_ref.shape[2]

    # Hoisted once per grid step (resident weights, tiny affine columns).
    w123 = w123_ref[...]
    w2b = w2b_ref[...]
    w3b = w3b_ref[...]
    w4 = w4_ref[...]
    shift123 = aff123_ref[:, 0:1]
    slope123 = aff123_ref[:, 1:2]
    shift2b = aff2_ref[:, 0:1]
    shift3b = aff3_ref[:, 0:1]
    scale3c = aff3_ref[:, 1:2]
    shift3c = aff3_ref[:, 2:3]
    shift4 = aff4_ref[:, 0:1]

    for b in range(bblk):                           # static unroll over batch block
        x = x_ref[b].astype(jnp.float32)            # (Cin, L)
        xb = x.astype(jnp.bfloat16)                 # bf16 MXU operand

        # ---- stage 1: fused k=1 convs of branches 1/2/3 (BN scale folded) ----
        s = jnp.dot(w123, xb, preferred_element_type=jnp.float32)      # (3C, L)
        s = s + shift123
        s = jnp.where(s >= 0.0, s, slope123 * s)    # per-row slope (br3: slope 1)

        # Branch1 is done -> store immediately (outer LeakyReLU already folded).
        out_ref[b, 0:cout, :] = s[0:cout, :].astype(out_ref.dtype)

        # Build both im2col slabs before the stage-2 matmuls so `s` dies early.
        _fill_im2col(col3_ref, s[2 * cout:3 * cout, :], 5, cout, L)
        _fill_im2col(col2_ref, s[cout:2 * cout, :], 3, cout, L)

        # ---- branch2: k=3 conv (taps folded into contraction) ----------------
        y2 = jnp.dot(w2b, col2_ref[...], preferred_element_type=jnp.float32)
        y2 = _leaky(y2 + shift2b, NEG_SLOPE * NEG_SLOPE)   # inner + outer LeakyReLU
        out_ref[b, cout:2 * cout, :] = y2.astype(out_ref.dtype)

        # ---- branch3: k=5 conv + BN + LeakyReLU + BN + LeakyReLU -------------
        y3 = jnp.dot(w3b, col3_ref[...], preferred_element_type=jnp.float32)
        y3 = _leaky(y3 + shift3b, NEG_SLOPE)
        y3 = _leaky(y3 * scale3c + shift3c, NEG_SLOPE * NEG_SLOPE)
        out_ref[b, 2 * cout:3 * cout, :] = y3.astype(out_ref.dtype)

        # ---- branch4: MaxPool1d(3,1,1) + k=1 conv -----------------------------
        _fill_maxpool3(pool_ref, x, L)
        y4 = jnp.dot(w4, pool_ref[...], preferred_element_type=jnp.float32)
        y4 = _leaky(y4 + shift4, NEG_SLOPE * NEG_SLOPE)
        out_ref[b, 3 * cout:4 * cout, :] = y4.astype(out_ref.dtype)


# ---------------------------------------------------------------------------
# Parameter folding / wrapper (tiny constant math outside the kernel)
# ---------------------------------------------------------------------------
def bn_fold(gamma, beta, rmean, rvar, conv_bias):
    """Fold conv bias + eval-mode BatchNorm into per-channel (scale, shift)."""
    s = gamma / jnp.sqrt(rvar + BN_EPS)
    return s, s * (conv_bias - rmean) + beta


def _vmem_bytes(bblk, cin, cout, L, x_bytes, out_bytes):
    io = 2 * bblk * L * (cin * x_bytes + 4 * cout * out_bytes)        # dbl-buffered x/out
    wts = 2 * 2 * (3 * cout * cin + 8 * cout * cout + cout * cin)     # bf16 weights, dbl
    aff = 2 * 4 * (3 * cout * 2 + cout * 5)
    scr = 2 * L * (8 * cout + cin)                                    # bf16 col2/col3/pool
    tmp = bblk * 4 * L * (3 * cout + 2 * cout + 2 * cin)              # f32 temporaries
    return io + wts + aff + scr + tmp


def _pick_batch_block(N, cin, cout, L, x_bytes, out_bytes, budget=40 * 2 ** 20):
    best = 1
    for b in range(1, min(N, 8) + 1):
        if N % b == 0 and _vmem_bytes(b, cin, cout, L, x_bytes, out_bytes) <= budget:
            best = b
    return best


def incep_forward(x_ncl, p, *, out_dtype=jnp.float32):
    N, cin, L = x_ncl.shape
    cout = p['w1'].shape[0]
    assert L >= 3, "kernel assumes L >= 3"
    f32 = jnp.float32
    ones = jnp.ones((cout,), f32)

    # Stage-1 fused weights: BN scales folded into the weight rows.
    s2a, sh2a = bn_fold(*p['bn2a'], p['b2a'])
    s3a, sh3a = bn_fold(*p['bn3a'], p['b3a'])
    scale123 = jnp.concatenate([ones, s2a, s3a])
    w123 = (jnp.concatenate([p['w1'], p['w2a'], p['w3a']], axis=0)
            * scale123[:, None]).astype(jnp.bfloat16)                  # (3C, Cin)
    shift123 = jnp.concatenate([p['b1'], sh2a, sh3a])
    slope123 = jnp.concatenate([jnp.full((cout,), NEG_SLOPE, f32),
                                jnp.full((cout,), NEG_SLOPE, f32),
                                ones])                                 # br3: no inner act
    aff123 = jnp.stack([shift123, slope123], axis=1)                   # (3C, 2)

    # Branch2 second conv: taps + BN scale folded into contraction weight.
    s2b, sh2b = bn_fold(*p['bn2b'], p['b2b'])
    w2b = (jnp.transpose(p['w2b'], (1, 0, 2)).reshape(cout, 3 * cout)
           * s2b[:, None]).astype(jnp.bfloat16)                        # (C, 3C)
    aff2 = sh2b[:, None]                                               # (C, 1)

    # Branch3 second conv + second BN.
    s3b, sh3b = bn_fold(*p['bn3b'], p['b3b'])
    s3c, sh3c = bn_fold(*p['bn3c'], jnp.zeros((cout,), f32))
    w3b = (jnp.transpose(p['w3b'], (1, 0, 2)).reshape(cout, 5 * cout)
           * s3b[:, None]).astype(jnp.bfloat16)                        # (C, 5C)
    aff3 = jnp.stack([sh3b, s3c, sh3c], axis=1)                        # (C, 3)

    # Branch4 conv after maxpool.
    s4, sh4 = bn_fold(*p['bn4'], p['b4'])
    w4 = (p['w4'] * s4[:, None]).astype(jnp.bfloat16)                  # (C, Cin)
    aff4 = sh4[:, None]                                                # (C, 1)

    x_bytes = x_ncl.dtype.itemsize
    out_bytes = jnp.dtype(out_dtype).itemsize
    bblk = _pick_batch_block(N, cin, cout, L, x_bytes, out_bytes)
    vmem_limit = int(min(100 * 2 ** 20,
                         max(16 * 2 ** 20,
                             1.3 * _vmem_bytes(bblk, cin, cout, L, x_bytes, out_bytes))))

    kern = functools.partial(_incep_kernel, cout=cout, bblk=bblk)
    return pl.pallas_call(
        kern,
        out_shape=jax.ShapeDtypeStruct((N, 4 * cout, L), out_dtype),
        grid_spec=pltpu.PrefetchScalarGridSpec(
            num_scalar_prefetch=0,
            grid=(N // bblk,),
            in_specs=[
                pl.BlockSpec((bblk, cin, L), lambda n: (n, 0, 0)),     # x (native dtype)
                pl.BlockSpec((3 * cout, cin), lambda n: (0, 0)),       # w123  (bf16)
                pl.BlockSpec((3 * cout, 2), lambda n: (0, 0)),         # aff123
                pl.BlockSpec((cout, 3 * cout), lambda n: (0, 0)),      # w2b   (bf16)
                pl.BlockSpec((cout, 1), lambda n: (0, 0)),             # aff2
                pl.BlockSpec((cout, 5 * cout), lambda n: (0, 0)),      # w3b   (bf16)
                pl.BlockSpec((cout, 3), lambda n: (0, 0)),             # aff3
                pl.BlockSpec((cout, cin), lambda n: (0, 0)),           # w4    (bf16)
                pl.BlockSpec((cout, 1), lambda n: (0, 0)),             # aff4
            ],
            out_specs=pl.BlockSpec((bblk, 4 * cout, L), lambda n: (n, 0, 0)),
            scratch_shapes=[
                pltpu.VMEM((3 * cout, L), jnp.bfloat16),   # im2col slab k=3
                pltpu.VMEM((5 * cout, L), jnp.bfloat16),   # im2col slab k=5
                pltpu.VMEM((cin, L), jnp.bfloat16),        # maxpool(3,1,1)(x)
            ],
        ),
        compiler_params=pltpu.CompilerParams(
            dimension_semantics=("parallel",),             # megacore sharding on v7x
            vmem_limit_bytes=vmem_limit),
    )(x_ncl, w123, aff123, w2b, aff2, w3b, aff3, w4, aff4)


# ---------------------------------------------------------------------------
# Deterministic parameter construction
# ---------------------------------------------------------------------------
def make_params(key, cin, cout):
    keys = iter(jax.random.split(key, 40))

    def conv1(ci, co):
        bound = 1.0 / ci ** 0.5
        w = jax.random.uniform(next(keys), (co, ci), jnp.float32, -bound, bound)
        b = jax.random.uniform(next(keys), (co,), jnp.float32, -bound, bound)
        return w, b

    def convk(ksize, ci, co):                    # weight layout (K, Cout, Cin)
        bound = 1.0 / (ci * ksize) ** 0.5
        w = jax.random.uniform(next(keys), (ksize, co, ci), jnp.float32,
                               -bound, bound)
        b = jax.random.uniform(next(keys), (co,), jnp.float32, -bound, bound)
        return w, b

    def bn(co):
        gamma = jax.random.uniform(next(keys), (co,), jnp.float32, 0.5, 1.5)
        beta = 0.1 * jax.random.normal(next(keys), (co,), jnp.float32)
        rmean = 0.1 * jax.random.normal(next(keys), (co,), jnp.float32)
        rvar = jax.random.uniform(next(keys), (co,), jnp.float32, 0.5, 1.5)
        return gamma, beta, rmean, rvar

    p = {}
    p['w1'], p['b1'] = conv1(cin, cout)
    p['w2a'], p['b2a'] = conv1(cin, cout);     p['bn2a'] = bn(cout)
    p['w2b'], p['b2b'] = convk(3, cout, cout); p['bn2b'] = bn(cout)
    p['w3a'], p['b3a'] = conv1(cin, cout);     p['bn3a'] = bn(cout)
    p['w3b'], p['b3b'] = convk(5, cout, cout); p['bn3b'] = bn(cout)
    p['bn3c'] = bn(cout)
    p['w4'], p['b4'] = conv1(cin, cout);       p['bn4'] = bn(cout)
    return p


# ---------------------------------------------------------------------------
# Pure-JAX reference (mirrors the PyTorch module, eval-mode BN)
# ---------------------------------------------------------------------------
def _ref_conv1d(x, w, b):
    if w.ndim == 2:
        w = w[None]
    K = w.shape[0]
    pad = (K - 1) // 2
    N, Ci, L = x.shape
    xp = jnp.pad(x, ((0, 0), (0, 0), (pad, pad)))
    out = jnp.zeros((N, w.shape[1], L), jnp.float32)
    for k in range(K):
        out = out + jnp.einsum('oc,ncl->nol', w[k], xp[:, :, k:k + L])
    return out + b[None, :, None]


def _ref_bn(x, gamma, beta, rmean, rvar):
    return (gamma[None, :, None] * (x - rmean[None, :, None])
            / jnp.sqrt(rvar[None, :, None] + BN_EPS) + beta[None, :, None])


def _ref_leaky(x):
    return jnp.where(x >= 0, x, NEG_SLOPE * x)


def _ref_maxpool3(x):
    L = x.shape[2]
    xp = jnp.pad(x, ((0, 0), (0, 0), (1, 1)), constant_values=-jnp.inf)
    return jnp.maximum(jnp.maximum(xp[:, :, 0:L], xp[:, :, 1:L + 1]),
                       xp[:, :, 2:L + 2])


def incep_reference(x, p):
    b1 = _ref_conv1d(x, p['w1'], p['b1'])
    t = _ref_leaky(_ref_bn(_ref_conv1d(x, p['w2a'], p['b2a']), *p['bn2a']))
    b2 = _ref_leaky(_ref_bn(_ref_conv1d(t, p['w2b'], p['b2b']), *p['bn2b']))
    t = _ref_bn(_ref_conv1d(x, p['w3a'], p['b3a']), *p['bn3a'])
    t = _ref_leaky(_ref_bn(_ref_conv1d(t, p['w3b'], p['b3b']), *p['bn3b']))
    b3 = _ref_leaky(_ref_bn(t, *p['bn3c']))
    t = _ref_maxpool3(x)
    b4 = _ref_leaky(_ref_bn(_ref_conv1d(t, p['w4'], p['b4']), *p['bn4']))
    return _ref_leaky(jnp.concatenate([b1, b2, b3, b4], axis=1))


if __name__ == "__main__":
    key = jax.random.PRNGKey(0)
    kx, kp = jax.random.split(key)

    N, C_IN, L, C_OUT = 2, 4, 16, 8
    x = jax.random.normal(kx, (N, C_IN, L), dtype=jnp.float32)   # NCL like PyTorch
    params = make_params(kp, C_IN, C_OUT)

    out = jax.block_until_ready(incep_forward(x, params))
    assert out.shape == (N, 4 * C_OUT, L), out.shape
    assert bool(jnp.all(jnp.isfinite(out)))

    ref = incep_reference(x, params)
    max_err = float(jnp.max(jnp.abs(out - ref)))
    scale = float(jnp.max(jnp.abs(ref)))
    # bf16 MXU operands: allow ~2% of the output dynamic range.
    assert max_err <= 2e-2 * max(1.0, scale), (max_err, scale)

    print("KERNEL_OK")
</pallas_src>

<mosaic_0001>
module attributes {stable_mosaic.version = 11 : i64} {
  func.func @_incep_kernel(%arg0: i32, %arg1: memref<2x4x16xf32, #tpu.memory_space<vmem>>, %arg2: memref<24x4xbf16, #tpu.memory_space<vmem>>, %arg3: memref<24x2xf32, #tpu.memory_space<vmem>>, %arg4: memref<8x24xbf16, #tpu.memory_space<vmem>>, %arg5: memref<8x1xf32, #tpu.memory_space<vmem>>, %arg6: memref<8x40xbf16, #tpu.memory_space<vmem>>, %arg7: memref<8x3xf32, #tpu.memory_space<vmem>>, %arg8: memref<8x4xbf16, #tpu.memory_space<vmem>>, %arg9: memref<8x1xf32, #tpu.memory_space<vmem>>, %arg10: memref<2x32x16xf32, #tpu.memory_space<vmem>>, %arg11: memref<24x16xbf16, #tpu.memory_space<vmem>>, %arg12: memref<40x16xbf16, #tpu.memory_space<vmem>>, %arg13: memref<4x16xbf16, #tpu.memory_space<vmem>>) attributes {dimension_semantics = [#tpu.dimension_semantics<parallel>], iteration_bounds = array<i64: 1>, scalar_prefetch = 0 : i64, scratch_operands = 3 : i64, tpu.core_type = #tpu.core_type<tc>, window_params = [{transform_indices = @transform_0, window_bounds = array<i64: 2, 4, 16>}, {pipeline_mode = #tpu.pipeline_mode<synchronous>, transform_indices = @transform_1, window_bounds = array<i64: 24, 4>}, {pipeline_mode = #tpu.pipeline_mode<synchronous>, transform_indices = @transform_2, window_bounds = array<i64: 24, 2>}, {pipeline_mode = #tpu.pipeline_mode<synchronous>, transform_indices = @transform_3, window_bounds = array<i64: 8, 24>}, {pipeline_mode = #tpu.pipeline_mode<synchronous>, transform_indices = @transform_4, window_bounds = array<i64: 8, 1>}, {pipeline_mode = #tpu.pipeline_mode<synchronous>, transform_indices = @transform_5, window_bounds = array<i64: 8, 40>}, {pipeline_mode = #tpu.pipeline_mode<synchronous>, transform_indices = @transform_6, window_bounds = array<i64: 8, 3>}, {pipeline_mode = #tpu.pipeline_mode<synchronous>, transform_indices = @transform_7, window_bounds = array<i64: 8, 4>}, {pipeline_mode = #tpu.pipeline_mode<synchronous>, transform_indices = @transform_8, window_bounds = array<i64: 8, 1>}, {transform_indices = @transform_9, window_bounds = array<i64: 2, 32, 16>}]} {
    %c0 = arith.constant 0 : index
    %c0_0 = arith.constant 0 : index
    %0 = vector.load %arg2[%c0, %c0_0] : memref<24x4xbf16, #tpu.memory_space<vmem>>, vector<24x4xbf16>
    %c0_1 = arith.constant 0 : index
    %c0_2 = arith.constant 0 : index
    %1 = vector.load %arg4[%c0_1, %c0_2] : memref<8x24xbf16, #tpu.memory_space<vmem>>, vector<8x24xbf16>
    %c0_3 = arith.constant 0 : index
    %c0_4 = arith.constant 0 : index
    %2 = vector.load %arg6[%c0_3, %c0_4] : memref<8x40xbf16, #tpu.memory_space<vmem>>, vector<8x40xbf16>
    %c0_5 = arith.constant 0 : index
    %c0_6 = arith.constant 0 : index
    %3 = vector.load %arg8[%c0_5, %c0_6] : memref<8x4xbf16, #tpu.memory_space<vmem>>, vector<8x4xbf16>
    %c0_7 = arith.constant 0 : index
    %c0_8 = arith.constant 0 : index
    %4 = vector.load %arg3[%c0_7, %c0_8] : memref<24x2xf32, #tpu.memory_space<vmem>>, vector<24x1xf32>
    %c0_9 = arith.constant 0 : index
    %c1 = arith.constant 1 : index
    %5 = vector.load %arg3[%c0_9, %c1] : memref<24x2xf32, #tpu.memory_space<vmem>>, vector<24x1xf32>
    %c0_10 = arith.constant 0 : index
    %c0_11 = arith.constant 0 : index
    %6 = vector.load %arg5[%c0_10, %c0_11] : memref<8x1xf32, #tpu.memory_space<vmem>>, vector<8x1xf32>
    %c0_12 = arith.constant 0 : index
    %c0_13 = arith.constant 0 : index
    %7 = vector.load %arg7[%c0_12, %c0_13] : memref<8x3xf32, #tpu.memory_space<vmem>>, vector<8x1xf32>
    %c0_14 = arith.constant 0 : index
    %c1_15 = arith.constant 1 : index
    %8 = vector.load %arg7[%c0_14, %c1_15] : memref<8x3xf32, #tpu.memory_space<vmem>>, vector<8x1xf32>
    %c0_16 = arith.constant 0 : index
    %c2 = arith.constant 2 : index
    %9 = vector.load %arg7[%c0_16, %c2] : memref<8x3xf32, #tpu.memory_space<vmem>>, vector<8x1xf32>
    %c0_17 = arith.constant 0 : index
    %c0_18 = arith.constant 0 : index
    %10 = vector.load %arg9[%c0_17, %c0_18] : memref<8x1xf32, #tpu.memory_space<vmem>>, vector<8x1xf32>
    %c0_19 = arith.constant 0 : index
    %c0_20 = arith.constant 0 : index
    %c0_21 = arith.constant 0 : index
    %11 = vector.load %arg1[%c0_19, %c0_20, %c0_21] : memref<2x4x16xf32, #tpu.memory_space<vmem>>, vector<1x4x16xf32>
    %12 = vector.shape_cast %11 : vector<1x4x16xf32> to vector<4x16xf32>
    %13 = arith.truncf %12 : vector<4x16xf32> to vector<4x16xbf16>
    %cst = arith.constant dense<0.000000e+00> : vector<24x16xf32>
    %14 = tpu.matmul %0, %13, %cst {dimension_numbers = #tpu.dot_dimension_numbers<[1], [0], [0], [1], [0, 0, 1, 1], [], []>} : vector<24x4xbf16>, vector<4x16xbf16>, vector<24x16xf32> -> vector<24x16xf32>
    %15 = vector.broadcast %4 : vector<24x1xf32> to vector<24x16xf32>
    %16 = arith.addf %14, %15 : vector<24x16xf32>
    %cst_22 = arith.constant 0.000000e+00 : f32
    %17 = vector.broadcast %cst_22 : f32 to vector<24x16xf32>
    %18 = arith.cmpf oge, %16, %17 : vector<24x16xf32>
    %19 = vector.broadcast %5 : vector<24x1xf32> to vector<24x16xf32>
    %20 = arith.mulf %19, %16 : vector<24x16xf32>
    %21 = arith.select %18, %16, %20 : vector<24x16xi1>, vector<24x16xf32>
    %22 = vector.extract_strided_slice %21 {offsets = [0, 0], sizes = [8, 16], strides = [1, 1]} : vector<24x16xf32> to vector<8x16xf32>
    %c0_23 = arith.constant 0 : index
    %c0_24 = arith.constant 0 : index
    %c0_25 = arith.constant 0 : index
    %23 = vector.load %arg10[%c0_23, %c0_24, %c0_25] : memref<2x32x16xf32, #tpu.memory_space<vmem>>, vector<1x8x16xf32>
    %24 = vector.shape_cast %23 : vector<1x8x16xf32> to vector<8x16xf32>
    %25 = vector.shape_cast %22 : vector<8x16xf32> to vector<1x8x16xf32>
    tpu.vector_store %arg10[%c0_23, %c0_24, %c0_25], %25 {strides = array<i32>} : memref<2x32x16xf32, #tpu.memory_space<vmem>>, vector<1x8x16xf32>,
    %26 = vector.extract_strided_slice %21 {offsets = [16, 0], sizes = [8, 16], strides = [1, 1]} : vector<24x16xf32> to vector<8x16xf32>
    %27 = vector.extract_strided_slice %26 {offsets = [0, 0], sizes = [8, 14], strides = [1, 1]} : vector<8x16xf32> to vector<8x14xf32>
    %28 = arith.truncf %27 : vector<8x14xf32> to vector<8x14xbf16>
    %c0_26 = arith.constant 0 : index
    %c2_27 = arith.constant 2 : index
    %29 = vector.load %arg12[%c0_26, %c2_27] : memref<40x16xbf16, #tpu.memory_space<vmem>>, vector<8x14xbf16>
    tpu.vector_store %arg12[%c0_26, %c2_27], %28 {strides = array<i32>} : memref<40x16xbf16, #tpu.memory_space<vmem>>, vector<8x14xbf16>,
    %cst_28 = arith.constant 0.000000e+00 : bf16
    %30 = vector.broadcast %cst_28 : bf16 to vector<8x2xbf16>
    %c0_29 = arith.constant 0 : index
    %c0_30 = arith.constant 0 : index
    %31 = vector.load %arg12[%c0_29, %c0_30] : memref<40x16xbf16, #tpu.memory_space<vmem>>, vector<8x2xbf16>
    tpu.vector_store %arg12[%c0_29, %c0_30], %30 {strides = array<i32>} : memref<40x16xbf16, #tpu.memory_space<vmem>>, vector<8x2xbf16>,
    %32 = vector.extract_strided_slice %26 {offsets = [0, 0], sizes = [8, 15], strides = [1, 1]} : vector<8x16xf32> to vector<8x15xf32>
    %33 = arith.truncf %32 : vector<8x15xf32> to vector<8x15xbf16>
    %c8 = arith.constant 8 : index
    %c1_31 = arith.constant 1 : index
    %34 = vector.load %arg12[%c8, %c1_31] : memref<40x16xbf16, #tpu.memory_space<vmem>>, vector<8x15xbf16>
    tpu.vector_store %arg12[%c8, %c1_31], %33 {strides = array<i32>} : memref<40x16xbf16, #tpu.memory_space<vmem>>, vector<8x15xbf16>,
    %cst_32 = arith.constant 0.000000e+00 : bf16
    %35 = vector.broadcast %cst_32 : bf16 to vector<8x1xbf16>
    %c8_33 = arith.constant 8 : index
    %c0_34 = arith.constant 0 : index
    %36 = vector.load %arg12[%c8_33, %c0_34] : memref<40x16xbf16, #tpu.memory_space<vmem>>, vector<8x1xbf16>
    tpu.vector_store %arg12[%c8_33, %c0_34], %35 {strides = array<i32>} : memref<40x16xbf16, #tpu.memory_space<vmem>>, vector<8x1xbf16>,
    %37 = arith.truncf %26 : vector<8x16xf32> to vector<8x16xbf16>
    %c16 = arith.constant 16 : index
    %c0_35 = arith.constant 0 : index
    %38 = vector.load %arg12[%c16, %c0_35] : memref<40x16xbf16, #tpu.memory_space<vmem>>, vector<8x16xbf16>
    tpu.vector_store %arg12[%c16, %c0_35], %37 {strides = array<i32>} : memref<40x16xbf16, #tpu.memory_space<vmem>>, vector<8x16xbf16>,
    %39 = vector.extract_strided_slice %26 {offsets = [0, 1], sizes = [8, 15], strides = [1, 1]} : vector<8x16xf32> to vector<8x15xf32>
    %40 = arith.truncf %39 : vector<8x15xf32> to vector<8x15xbf16>
    %c24 = arith.constant 24 : index
    %c0_36 = arith.constant 0 : index
    %41 = vector.load %arg12[%c24, %c0_36] : memref<40x16xbf16, #tpu.memory_space<vmem>>, vector<8x15xbf16>
    tpu.vector_store %arg12[%c24, %c0_36], %40 {strides = array<i32>} : memref<40x16xbf16, #tpu.memory_space<vmem>>, vector<8x15xbf16>,
    %cst_37 = arith.constant 0.000000e+00 : bf16
    %42 = vector.broadcast %cst_37 : bf16 to vector<8x1xbf16>
    %c24_38 = arith.constant 24 : index
    %c15 = arith.constant 15 : index
    %43 = vector.load %arg12[%c24_38, %c15] : memref<40x16xbf16, #tpu.memory_space<vmem>>, vector<8x1xbf16>
    tpu.vector_store %arg12[%c24_38, %c15], %42 {strides = array<i32>} : memref<40x16xbf16, #tpu.memory_space<vmem>>, vector<8x1xbf16>,
    %44 = vector.extract_strided_slice %26 {offsets = [0, 2], sizes = [8, 14], strides = [1, 1]} : vector<8x16xf32> to vector<8x14xf32>
    %45 = arith.truncf %44 : vector<8x14xf32> to vector<8x14xbf16>
    %c32 = arith.constant 32 : index
    %c0_39 = arith.constant 0 : index
    %46 = vector.load %arg12[%c32, %c0_39] : memref<40x16xbf16, #tpu.memory_space<vmem>>, vector<8x14xbf16>
    tpu.vector_store %arg12[%c32, %c0_39], %45 {strides = array<i32>} : memref<40x16xbf16, #tpu.memory_space<vmem>>, vector<8x14xbf16>,
    %cst_40 = arith.constant 0.000000e+00 : bf16
    %47 = vector.broadcast %cst_40 : bf16 to vector<8x2xbf16>
    %c32_41 = arith.constant 32 : index
    %c14 = arith.constant 14 : index
    %48 = vector.load %arg12[%c32_41, %c14] : memref<40x16xbf16, #tpu.memory_space<vmem>>, vector<8x2xbf16>
    tpu.vector_store %arg12[%c32_41, %c14], %47 {strides = array<i32>} : memref<40x16xbf16, #tpu.memory_space<vmem>>, vector<8x2xbf16>,
    %49 = vector.extract_strided_slice %21 {offsets = [8, 0], sizes = [8, 16], strides = [1, 1]} : vector<24x16xf32> to vector<8x16xf32>
    %50 = vector.extract_strided_slice %49 {offsets = [0, 0], sizes = [8, 15], strides = [1, 1]} : vector<8x16xf32> to vector<8x15xf32>
    %51 = arith.truncf %50 : vector<8x15xf32> to vector<8x15xbf16>
    %c0_42 = arith.constant 0 : index
    %c1_43 = arith.constant 1 : index
    %52 = vector.load %arg11[%c0_42, %c1_43] : memref<24x16xbf16, #tpu.memory_space<vmem>>, vector<8x15xbf16>
    tpu.vector_store %arg11[%c0_42, %c1_43], %51 {strides = array<i32>} : memref<24x16xbf16, #tpu.memory_space<vmem>>, vector<8x15xbf16>,
    %cst_44 = arith.constant 0.000000e+00 : bf16
    %53 = vector.broadcast %cst_44 : bf16 to vector<8x1xbf16>
    %c0_45 = arith.constant 0 : index
    %c0_46 = arith.constant 0 : index
    %54 = vector.load %arg11[%c0_45, %c0_46] : memref<24x16xbf16, #tpu.memory_space<vmem>>, vector<8x1xbf16>
    tpu.vector_store %arg11[%c0_45, %c0_46], %53 {strides = array<i32>} : memref<24x16xbf16, #tpu.memory_space<vmem>>, vector<8x1xbf16>,
    %55 = arith.truncf %49 : vector<8x16xf32> to vector<8x16xbf16>
    %c8_47 = arith.constant 8 : index
    %c0_48 = arith.constant 0 : index
    %56 = vector.load %arg11[%c8_47, %c0_48] : memref<24x16xbf16, #tpu.memory_space<vmem>>, vector<8x16xbf16>
    tpu.vector_store %arg11[%c8_47, %c0_48], %55 {strides = array<i32>} : memref<24x16xbf16, #tpu.memory_space<vmem>>, vector<8x16xbf16>,
    %57 = vector.extract_strided_slice %49 {offsets = [0, 1], sizes = [8, 15], strides = [1, 1]} : vector<8x16xf32> to vector<8x15xf32>
    %58 = arith.truncf %57 : vector<8x15xf32> to vector<8x15xbf16>
    %c16_49 = arith.constant 16 : index
    %c0_50 = arith.constant 0 : index
    %59 = vector.load %arg11[%c16_49, %c0_50] : memref<24x16xbf16, #tpu.memory_space<vmem>>, vector<8x15xbf16>
    tpu.vector_store %arg11[%c16_49, %c0_50], %58 {strides = array<i32>} : memref<24x16xbf16, #tpu.memory_space<vmem>>, vector<8x15xbf16>,
    %cst_51 = arith.constant 0.000000e+00 : bf16
    %60 = vector.broadcast %cst_51 : bf16 to vector<8x1xbf16>
    %c16_52 = arith.constant 16 : index
    %c15_53 = arith.constant 15 : index
    %61 = vector.load %arg11[%c16_52, %c15_53] : memref<24x16xbf16, #tpu.memory_space<vmem>>, vector<8x1xbf16>
    tpu.vector_store %arg11[%c16_52, %c15_53], %60 {strides = array<i32>} : memref<24x16xbf16, #tpu.memory_space<vmem>>, vector<8x1xbf16>,
    %c0_54 = arith.constant 0 : index
    %c0_55 = arith.constant 0 : index
    %62 = vector.load %arg11[%c0_54, %c0_55] : memref<24x16xbf16, #tpu.memory_space<vmem>>, vector<24x16xbf16>
    %cst_56 = arith.constant dense<0.000000e+00> : vector<8x16xf32>
    %63 = tpu.matmul %1, %62, %cst_56 {dimension_numbers = #tpu.dot_dimension_numbers<[1], [0], [0], [1], [0, 0, 1, 1], [], []>} : vector<8x24xbf16>, vector<24x16xbf16>, vector<8x16xf32> -> vector<8x16xf32>
    %64 = vector.broadcast %6 : vector<8x1xf32> to vector<8x16xf32>
    %65 = arith.addf %63, %64 : vector<8x16xf32>
    %cst_57 = arith.constant 0.000000e+00 : f32
    %66 = vector.broadcast %cst_57 : f32 to vector<8x16xf32>
    %67 = arith.cmpf oge, %65, %66 : vector<8x16xf32>
    %cst_58 = arith.constant 9.99999974E-5 : f32
    %68 = vector.broadcast %cst_58 : f32 to vector<8x16xf32>
    %69 = arith.mulf %68, %65 : vector<8x16xf32>
    %70 = arith.select %67, %65, %69 : vector<8x16xi1>, vector<8x16xf32>
    %c0_59 = arith.constant 0 : index
    %c8_60 = arith.constant 8 : index
    %c0_61 = arith.constant 0 : index
    %71 = vector.load %arg10[%c0_59, %c8_60, %c0_61] : memref<2x32x16xf32, #tpu.memory_space<vmem>>, vector<1x8x16xf32>
    %72 = vector.shape_cast %71 : vector<1x8x16xf32> to vector<8x16xf32>
    %73 = vector.shape_cast %70 : vector<8x16xf32> to vector<1x8x16xf32>
    tpu.vector_store %arg10[%c0_59, %c8_60, %c0_61], %73 {strides = array<i32>} : memref<2x32x16xf32, #tpu.memory_space<vmem>>, vector<1x8x16xf32>,
    %c0_62 = arith.constant 0 : index
    %c0_63 = arith.constant 0 : index
    %74 = vector.load %arg12[%c0_62, %c0_63] : memref<40x16xbf16, #tpu.memory_space<vmem>>, vector<40x16xbf16>
    %cst_64 = arith.constant dense<0.000000e+00> : vector<8x16xf32>
    %75 = tpu.matmul %2, %74, %cst_64 {dimension_numbers = #tpu.dot_dimension_numbers<[1], [0], [0], [1], [0, 0, 1, 1], [], []>} : vector<8x40xbf16>, vector<40x16xbf16>, vector<8x16xf32> -> vector<8x16xf32>
    %76 = vector.broadcast %7 : vector<8x1xf32> to vector<8x16xf32>
    %77 = arith.addf %75, %76 : vector<8x16xf32>
    %cst_65 = arith.constant 0.000000e+00 : f32
    %78 = vector.broadcast %cst_65 : f32 to vector<8x16xf32>
    %79 = arith.cmpf oge, %77, %78 : vector<8x16xf32>
    %cst_66 = arith.constant 0.00999999977 : f32
    %80 = vector.broadcast %cst_66 : f32 to vector<8x16xf32>
    %81 = arith.mulf %80, %77 : vector<8x16xf32>
    %82 = arith.select %79, %77, %81 : vector<8x16xi1>, vector<8x16xf32>
    %83 = vector.broadcast %8 : vector<8x1xf32> to vector<8x16xf32>
    %84 = arith.mulf %82, %83 : vector<8x16xf32>
    %85 = vector.broadcast %9 : vector<8x1xf32> to vector<8x16xf32>
    %86 = arith.addf %84, %85 : vector<8x16xf32>
    %cst_67 = arith.constant 0.000000e+00 : f32
    %87 = vector.broadcast %cst_67 : f32 to vector<8x16xf32>
    %88 = arith.cmpf oge, %86, %87 : vector<8x16xf32>
    %cst_68 = arith.constant 9.99999974E-5 : f32
    %89 = vector.broadcast %cst_68 : f32 to vector<8x16xf32>
    %90 = arith.mulf %89, %86 : vector<8x16xf32>
    %91 = arith.select %88, %86, %90 : vector<8x16xi1>, vector<8x16xf32>
    %c0_69 = arith.constant 0 : index
    %c16_70 = arith.constant 16 : index
    %c0_71 = arith.constant 0 : index
    %92 = vector.load %arg10[%c0_69, %c16_70, %c0_71] : memref<2x32x16xf32, #tpu.memory_space<vmem>>, vector<1x8x16xf32>
    %93 = vector.shape_cast %92 : vector<1x8x16xf32> to vector<8x16xf32>
    %94 = vector.shape_cast %91 : vector<8x16xf32> to vector<1x8x16xf32>
    tpu.vector_store %arg10[%c0_69, %c16_70, %c0_71], %94 {strides = array<i32>} : memref<2x32x16xf32, #tpu.memory_space<vmem>>, vector<1x8x16xf32>,
    %95 = vector.extract_strided_slice %12 {offsets = [0, 0], sizes = [4, 14], strides = [1, 1]} : vector<4x16xf32> to vector<4x14xf32>
    %96 = vector.extract_strided_slice %12 {offsets = [0, 1], sizes = [4, 14], strides = [1, 1]} : vector<4x16xf32> to vector<4x14xf32>
    %97 = arith.maximumf %95, %96 : vector<4x14xf32>
    %98 = vector.extract_strided_slice %12 {offsets = [0, 2], sizes = [4, 14], strides = [1, 1]} : vector<4x16xf32> to vector<4x14xf32>
    %99 = arith.maximumf %97, %98 : vector<4x14xf32>
    %100 = arith.truncf %99 : vector<4x14xf32> to vector<4x14xbf16>
    %c0_72 = arith.constant 0 : index
    %c1_73 = arith.constant 1 : index
    %101 = vector.load %arg13[%c0_72, %c1_73] : memref<4x16xbf16, #tpu.memory_space<vmem>>, vector<4x14xbf16>
    tpu.vector_store %arg13[%c0_72, %c1_73], %100 {strides = array<i32>} : memref<4x16xbf16, #tpu.memory_space<vmem>>, vector<4x14xbf16>,
    %102 = vector.extract_strided_slice %12 {offsets = [0, 0], sizes = [4, 1], strides = [1, 1]} : vector<4x16xf32> to vector<4x1xf32>
    %103 = vector.extract_strided_slice %12 {offsets = [0, 1], sizes = [4, 1], strides = [1, 1]} : vector<4x16xf32> to vector<4x1xf32>
    %104 = arith.maximumf %102, %103 : vector<4x1xf32>
    %105 = arith.truncf %104 : vector<4x1xf32> to vector<4x1xbf16>
    %c0_74 = arith.constant 0 : index
    %c0_75 = arith.constant 0 : index
    %106 = vector.load %arg13[%c0_74, %c0_75] : memref<4x16xbf16, #tpu.memory_space<vmem>>, vector<4x1xbf16>
    tpu.vector_store %arg13[%c0_74, %c0_75], %105 {strides = array<i32>} : memref<4x16xbf16, #tpu.memory_space<vmem>>, vector<4x1xbf16>,
    %107 = vector.extract_strided_slice %12 {offsets = [0, 14], sizes = [4, 1], strides = [1, 1]} : vector<4x16xf32> to vector<4x1xf32>
    %108 = vector.extract_strided_slice %12 {offsets = [0, 15], sizes = [4, 1], strides = [1, 1]} : vector<4x16xf32> to vector<4x1xf32>
    %109 = arith.maximumf %107, %108 : vector<4x1xf32>
    %110 = arith.truncf %109 : vector<4x1xf32> to vector<4x1xbf16>
    %c0_76 = arith.constant 0 : index
    %c15_77 = arith.constant 15 : index
    %111 = vector.load %arg13[%c0_76, %c15_77] : memref<4x16xbf16, #tpu.memory_space<vmem>>, vector<4x1xbf16>
    tpu.vector_store %arg13[%c0_76, %c15_77], %110 {strides = array<i32>} : memref<4x16xbf16, #tpu.memory_space<vmem>>, vector<4x1xbf16>,
    %c0_78 = arith.constant 0 : index
    %c0_79 = arith.constant 0 : index
    %112 = vector.load %arg13[%c0_78, %c0_79] : memref<4x16xbf16, #tpu.memory_space<vmem>>, vector<4x16xbf16>
    %cst_80 = arith.constant dense<0.000000e+00> : vector<8x16xf32>
    %113 = tpu.matmul %3, %112, %cst_80 {dimension_numbers = #tpu.dot_dimension_numbers<[1], [0], [0], [1], [0, 0, 1, 1], [], []>} : vector<8x4xbf16>, vector<4x16xbf16>, vector<8x16xf32> -> vector<8x16xf32>
    %114 = vector.broadcast %10 : vector<8x1xf32> to vector<8x16xf32>
    %115 = arith.addf %113, %114 : vector<8x16xf32>
    %cst_81 = arith.constant 0.000000e+00 : f32
    %116 = vector.broadcast %cst_81 : f32 to vector<8x16xf32>
    %117 = arith.cmpf oge, %115, %116 : vector<8x16xf32>
    %cst_82 = arith.constant 9.99999974E-5 : f32
    %118 = vector.broadcast %cst_82 : f32 to vector<8x16xf32>
    %119 = arith.mulf %118, %115 : vector<8x16xf32>
    %120 = arith.select %117, %115, %119 : vector<8x16xi1>, vector<8x16xf32>
    %c0_83 = arith.constant 0 : index
    %c24_84 = arith.constant 24 : index
    %c0_85 = arith.constant 0 : index
    %121 = vector.load %arg10[%c0_83, %c24_84, %c0_85] : memref<2x32x16xf32, #tpu.memory_space<vmem>>, vector<1x8x16xf32>
    %122 = vector.shape_cast %121 : vector<1x8x16xf32> to vector<8x16xf32>
    %123 = vector.shape_cast %120 : vector<8x16xf32> to vector<1x8x16xf32>
    tpu.vector_store %arg10[%c0_83, %c24_84, %c0_85], %123 {strides = array<i32>} : memref<2x32x16xf32, #tpu.memory_space<vmem>>, vector<1x8x16xf32>,
    %c1_86 = arith.constant 1 : index
    %c0_87 = arith.constant 0 : index
    %c0_88 = arith.constant 0 : index
    %124 = vector.load %arg1[%c1_86, %c0_87, %c0_88] : memref<2x4x16xf32, #tpu.memory_space<vmem>>, vector<1x4x16xf32>
    %125 = vector.shape_cast %124 : vector<1x4x16xf32> to vector<4x16xf32>
    %126 = arith.truncf %125 : vector<4x16xf32> to vector<4x16xbf16>
    %cst_89 = arith.constant dense<0.000000e+00> : vector<24x16xf32>
    %127 = tpu.matmul %0, %126, %cst_89 {dimension_numbers = #tpu.dot_dimension_numbers<[1], [0], [0], [1], [0, 0, 1, 1], [], []>} : vector<24x4xbf16>, vector<4x16xbf16>, vector<24x16xf32> -> vector<24x16xf32>
    %128 = vector.broadcast %4 : vector<24x1xf32> to vector<24x16xf32>
    %129 = arith.addf %127, %128 : vector<24x16xf32>
    %cst_90 = arith.constant 0.000000e+00 : f32
    %130 = vector.broadcast %cst_90 : f32 to vector<24x16xf32>
    %131 = arith.cmpf oge, %129, %130 : vector<24x16xf32>
    %132 = vector.broadcast %5 : vector<24x1xf32> to vector<24x16xf32>
    %133 = arith.mulf %132, %129 : vector<24x16xf32>
    %134 = arith.select %131, %129, %133 : vector<24x16xi1>, vector<24x16xf32>
    %135 = vector.extract_strided_slice %134 {offsets = [0, 0], sizes = [8, 16], strides = [1, 1]} : vector<24x16xf32> to vector<8x16xf32>
    %c1_91 = arith.constant 1 : index
    %c0_92 = arith.constant 0 : index
    %c0_93 = arith.constant 0 : index
    %136 = vector.load %arg10[%c1_91, %c0_92, %c0_93] : memref<2x32x16xf32, #tpu.memory_space<vmem>>, vector<1x8x16xf32>
    %137 = vector.shape_cast %136 : vector<1x8x16xf32> to vector<8x16xf32>
    %138 = vector.shape_cast %135 : vector<8x16xf32> to vector<1x8x16xf32>
    tpu.vector_store %arg10[%c1_91, %c0_92, %c0_93], %138 {strides = array<i32>} : memref<2x32x16xf32, #tpu.memory_space<vmem>>, vector<1x8x16xf32>,
    %139 = vector.extract_strided_slice %134 {offsets = [16, 0], sizes = [8, 16], strides = [1, 1]} : vector<24x16xf32> to vector<8x16xf32>
    %140 = vector.extract_strided_slice %139 {offsets = [0, 0], sizes = [8, 14], strides = [1, 1]} : vector<8x16xf32> to vector<8x14xf32>
    %141 = arith.truncf %140 : vector<8x14xf32> to vector<8x14xbf16>
    %c0_94 = arith.constant 0 : index
    %c2_95 = arith.constant 2 : index
    %142 = vector.load %arg12[%c0_94, %c2_95] : memref<40x16xbf16, #tpu.memory_space<vmem>>, vector<8x14xbf16>
    tpu.vector_store %arg12[%c0_94, %c2_95], %141 {strides = array<i32>} : memref<40x16xbf16, #tpu.memory_space<vmem>>, vector<8x14xbf16>,
    %cst_96 = arith.constant 0.000000e+00 : bf16
    %143 = vector.broadcast %cst_96 : bf16 to vector<8x2xbf16>
    %c0_97 = arith.constant 0 : index
    %c0_98 = arith.constant 0 : index
    %144 = vector.load %arg12[%c0_97, %c0_98] : memref<40x16xbf16, #tpu.memory_space<vmem>>, vector<8x2xbf16>
    tpu.vector_store %arg12[%c0_97, %c0_98], %143 {strides = array<i32>} : memref<40x16xbf16, #tpu.memory_space<vmem>>, vector<8x2xbf16>,
    %145 = vector.extract_strided_slice %139 {offsets = [0, 0], sizes = [8, 15], strides = [1, 1]} : vector<8x16xf32> to vector<8x15xf32>
    %146 = arith.truncf %145 : vector<8x15xf32> to vector<8x15xbf16>
    %c8_99 = arith.constant 8 : index
    %c1_100 = arith.constant 1 : index
    %147 = vector.load %arg12[%c8_99, %c1_100] : memref<40x16xbf16, #tpu.memory_space<vmem>>, vector<8x15xbf16>
    tpu.vector_store %arg12[%c8_99, %c1_100], %146 {strides = array<i32>} : memref<40x16xbf16, #tpu.memory_space<vmem>>, vector<8x15xbf16>,
    %cst_101 = arith.constant 0.000000e+00 : bf16
    %148 = vector.broadcast %cst_101 : bf16 to vector<8x1xbf16>
    %c8_102 = arith.constant 8 : index
    %c0_103 = arith.constant 0 : index
    %149 = vector.load %arg12[%c8_102, %c0_103] : memref<40x16xbf16, #tpu.memory_space<vmem>>, vector<8x1xbf16>
    tpu.vector_store %arg12[%c8_102, %c0_103], %148 {strides = array<i32>} : memref<40x16xbf16, #tpu.memory_space<vmem>>, vector<8x1xbf16>,
    %150 = arith.truncf %139 : vector<8x16xf32> to vector<8x16xbf16>
    %c16_104 = arith.constant 16 : index
    %c0_105 = arith.constant 0 : index
    %151 = vector.load %arg12[%c16_104, %c0_105] : memref<40x16xbf16, #tpu.memory_space<vmem>>, vector<8x16xbf16>
    tpu.vector_store %arg12[%c16_104, %c0_105], %150 {strides = array<i32>} : memref<40x16xbf16, #tpu.memory_space<vmem>>, vector<8x16xbf16>,
    %152 = vector.extract_strided_slice %139 {offsets = [0, 1], sizes = [8, 15], strides = [1, 1]} : vector<8x16xf32> to vector<8x15xf32>
    %153 = arith.truncf %152 : vector<8x15xf32> to vector<8x15xbf16>
    %c24_106 = arith.constant 24 : index
    %c0_107 = arith.constant 0 : index
    %154 = vector.load %arg12[%c24_106, %c0_107] : memref<40x16xbf16, #tpu.memory_space<vmem>>, vector<8x15xbf16>
    tpu.vector_store %arg12[%c24_106, %c0_107], %153 {strides = array<i32>} : memref<40x16xbf16, #tpu.memory_space<vmem>>, vector<8x15xbf16>,
    %cst_108 = arith.constant 0.000000e+00 : bf16
    %155 = vector.broadcast %cst_108 : bf16 to vector<8x1xbf16>
    %c24_109 = arith.constant 24 : index
    %c15_110 = arith.constant 15 : index
    %156 = vector.load %arg12[%c24_109, %c15_110] : memref<40x16xbf16, #tpu.memory_space<vmem>>, vector<8x1xbf16>
    tpu.vector_store %arg12[%c24_109, %c15_110], %155 {strides = array<i32>} : memref<40x16xbf16, #tpu.memory_space<vmem>>, vector<8x1xbf16>,
    %157 = vector.extract_strided_slice %139 {offsets = [0, 2], sizes = [8, 14], strides = [1, 1]} : vector<8x16xf32> to vector<8x14xf32>
    %158 = arith.truncf %157 : vector<8x14xf32> to vector<8x14xbf16>
    %c32_111 = arith.constant 32 : index
    %c0_112 = arith.constant 0 : index
    %159 = vector.load %arg12[%c32_111, %c0_112] : memref<40x16xbf16, #tpu.memory_space<vmem>>, vector<8x14xbf16>
    tpu.vector_store %arg12[%c32_111, %c0_112], %158 {strides = array<i32>} : memref<40x16xbf16, #tpu.memory_space<vmem>>, vector<8x14xbf16>,
    %cst_113 = arith.constant 0.000000e+00 : bf16
    %160 = vector.broadcast %cst_113 : bf16 to vector<8x2xbf16>
    %c32_114 = arith.constant 32 : index
    %c14_115 = arith.constant 14 : index
    %161 = vector.load %arg12[%c32_114, %c14_115] : memref<40x16xbf16, #tpu.memory_space<vmem>>, vector<8x2xbf16>
    tpu.vector_store %arg12[%c32_114, %c14_115], %160 {strides = array<i32>} : memref<40x16xbf16, #tpu.memory_space<vmem>>, vector<8x2xbf16>,
    %162 = vector.extract_strided_slice %134 {offsets = [8, 0], sizes = [8, 16], strides = [1, 1]} : vector<24x16xf32> to vector<8x16xf32>
    %163 = vector.extract_strided_slice %162 {offsets = [0, 0], sizes = [8, 15], strides = [1, 1]} : vector<8x16xf32> to vector<8x15xf32>
    %164 = arith.truncf %163 : vector<8x15xf32> to vector<8x15xbf16>
    %c0_116 = arith.constant 0 : index
    %c1_117 = arith.constant 1 : index
    %165 = vector.load %arg11[%c0_116, %c1_117] : memref<24x16xbf16, #tpu.memory_space<vmem>>, vector<8x15xbf16>
    tpu.vector_store %arg11[%c0_116, %c1_117], %164 {strides = array<i32>} : memref<24x16xbf16, #tpu.memory_space<vmem>>, vector<8x15xbf16>,
    %cst_118 = arith.constant 0.000000e+00 : bf16
    %166 = vector.broadcast %cst_118 : bf16 to vector<8x1xbf16>
    %c0_119 = arith.constant 0 : index
    %c0_120 = arith.constant 0 : index
    %167 = vector.load %arg11[%c0_119, %c0_120] : memref<24x16xbf16, #tpu.memory_space<vmem>>, vector<8x1xbf16>
    tpu.vector_store %arg11[%c0_119, %c0_120], %166 {strides = array<i32>} : memref<24x16xbf16, #tpu.memory_space<vmem>>, vector<8x1xbf16>,
    %168 = arith.truncf %162 : vector<8x16xf32> to vector<8x16xbf16>
    %c8_121 = arith.constant 8 : index
    %c0_122 = arith.constant 0 : index
    %169 = vector.load %arg11[%c8_121, %c0_122] : memref<24x16xbf16, #tpu.memory_space<vmem>>, vector<8x16xbf16>
    tpu.vector_store %arg11[%c8_121, %c0_122], %168 {strides = array<i32>} : memref<24x16xbf16, #tpu.memory_space<vmem>>, vector<8x16xbf16>,
    %170 = vector.extract_strided_slice %162 {offsets = [0, 1], sizes = [8, 15], strides = [1, 1]} : vector<8x16xf32> to vector<8x15xf32>
    %171 = arith.truncf %170 : vector<8x15xf32> to vector<8x15xbf16>
    %c16_123 = arith.constant 16 : index
    %c0_124 = arith.constant 0 : index
    %172 = vector.load %arg11[%c16_123, %c0_124] : memref<24x16xbf16, #tpu.memory_space<vmem>>, vector<8x15xbf16>
    tpu.vector_store %arg11[%c16_123, %c0_124], %171 {strides = array<i32>} : memref<24x16xbf16, #tpu.memory_space<vmem>>, vector<8x15xbf16>,
    %cst_125 = arith.constant 0.000000e+00 : bf16
    %173 = vector.broadcast %cst_125 : bf16 to vector<8x1xbf16>
    %c16_126 = arith.constant 16 : index
    %c15_127 = arith.constant 15 : index
    %174 = vector.load %arg11[%c16_126, %c15_127] : memref<24x16xbf16, #tpu.memory_space<vmem>>, vector<8x1xbf16>
    tpu.vector_store %arg11[%c16_126, %c15_127], %173 {strides = array<i32>} : memref<24x16xbf16, #tpu.memory_space<vmem>>, vector<8x1xbf16>,
    %c0_128 = arith.constant 0 : index
    %c0_129 = arith.constant 0 : index
    %175 = vector.load %arg11[%c0_128, %c0_129] : memref<24x16xbf16, #tpu.memory_space<vmem>>, vector<24x16xbf16>
    %cst_130 = arith.constant dense<0.000000e+00> : vector<8x16xf32>
    %176 = tpu.matmul %1, %175, %cst_130 {dimension_numbers = #tpu.dot_dimension_numbers<[1], [0], [0], [1], [0, 0, 1, 1], [], []>} : vector<8x24xbf16>, vector<24x16xbf16>, vector<8x16xf32> -> vector<8x16xf32>
    %177 = vector.broadcast %6 : vector<8x1xf32> to vector<8x16xf32>
    %178 = arith.addf %176, %177 : vector<8x16xf32>
    %cst_131 = arith.constant 0.000000e+00 : f32
    %179 = vector.broadcast %cst_131 : f32 to vector<8x16xf32>
    %180 = arith.cmpf oge, %178, %179 : vector<8x16xf32>
    %cst_132 = arith.constant 9.99999974E-5 : f32
    %181 = vector.broadcast %cst_132 : f32 to vector<8x16xf32>
    %182 = arith.mulf %181, %178 : vector<8x16xf32>
    %183 = arith.select %180, %178, %182 : vector<8x16xi1>, vector<8x16xf32>
    %c1_133 = arith.constant 1 : index
    %c8_134 = arith.constant 8 : index
    %c0_135 = arith.constant 0 : index
    %184 = vector.load %arg10[%c1_133, %c8_134, %c0_135] : memref<2x32x16xf32, #tpu.memory_space<vmem>>, vector<1x8x16xf32>
    %185 = vector.shape_cast %184 : vector<1x8x16xf32> to vector<8x16xf32>
    %186 = vector.shape_cast %183 : vector<8x16xf32> to vector<1x8x16xf32>
    tpu.vector_store %arg10[%c1_133, %c8_134, %c0_135], %186 {strides = array<i32>} : memref<2x32x16xf32, #tpu.memory_space<vmem>>, vector<1x8x16xf32>,
    %c0_136 = arith.constant 0 : index
    %c0_137 = arith.constant 0 : index
    %187 = vector.load %arg12[%c0_136, %c0_137] : memref<40x16xbf16, #tpu.memory_space<vmem>>, vector<40x16xbf16>
    %cst_138 = arith.constant dense<0.000000e+00> : vector<8x16xf32>
    %188 = tpu.matmul %2, %187, %cst_138 {dimension_numbers = #tpu.dot_dimension_numbers<[1], [0], [0], [1], [0, 0, 1, 1], [], []>} : vector<8x40xbf16>, vector<40x16xbf16>, vector<8x16xf32> -> vector<8x16xf32>
    %189 = vector.broadcast %7 : vector<8x1xf32> to vector<8x16xf32>
    %190 = arith.addf %188, %189 : vector<8x16xf32>
    %cst_139 = arith.constant 0.000000e+00 : f32
    %191 = vector.broadcast %cst_139 : f32 to vector<8x16xf32>
    %192 = arith.cmpf oge, %190, %191 : vector<8x16xf32>
    %cst_140 = arith.constant 0.00999999977 : f32
    %193 = vector.broadcast %cst_140 : f32 to vector<8x16xf32>
    %194 = arith.mulf %193, %190 : vector<8x16xf32>
    %195 = arith.select %192, %190, %194 : vector<8x16xi1>, vector<8x16xf32>
    %196 = vector.broadcast %8 : vector<8x1xf32> to vector<8x16xf32>
    %197 = arith.mulf %195, %196 : vector<8x16xf32>
    %198 = vector.broadcast %9 : vector<8x1xf32> to vector<8x16xf32>
    %199 = arith.addf %197, %198 : vector<8x16xf32>
    %cst_141 = arith.constant 0.000000e+00 : f32
    %200 = vector.broadcast %cst_141 : f32 to vector<8x16xf32>
    %201 = arith.cmpf oge, %199, %200 : vector<8x16xf32>
    %cst_142 = arith.constant 9.99999974E-5 : f32
    %202 = vector.broadcast %cst_142 : f32 to vector<8x16xf32>
    %203 = arith.mulf %202, %199 : vector<8x16xf32>
    %204 = arith.select %201, %199, %203 : vector<8x16xi1>, vector<8x16xf32>
    %c1_143 = arith.constant 1 : index
    %c16_144 = arith.constant 16 : index
    %c0_145 = arith.constant 0 : index
    %205 = vector.load %arg10[%c1_143, %c16_144, %c0_145] : memref<2x32x16xf32, #tpu.memory_space<vmem>>, vector<1x8x16xf32>
    %206 = vector.shape_cast %205 : vector<1x8x16xf32> to vector<8x16xf32>
    %207 = vector.shape_cast %204 : vector<8x16xf32> to vector<1x8x16xf32>
    tpu.vector_store %arg10[%c1_143, %c16_144, %c0_145], %207 {strides = array<i32>} : memref<2x32x16xf32, #tpu.memory_space<vmem>>, vector<1x8x16xf32>,
    %208 = vector.extract_strided_slice %125 {offsets = [0, 0], sizes = [4, 14], strides = [1, 1]} : vector<4x16xf32> to vector<4x14xf32>
    %209 = vector.extract_strided_slice %125 {offsets = [0, 1], sizes = [4, 14], strides = [1, 1]} : vector<4x16xf32> to vector<4x14xf32>
    %210 = arith.maximumf %208, %209 : vector<4x14xf32>
    %211 = vector.extract_strided_slice %125 {offsets = [0, 2], sizes = [4, 14], strides = [1, 1]} : vector<4x16xf32> to vector<4x14xf32>
    %212 = arith.maximumf %210, %211 : vector<4x14xf32>
    %213 = arith.truncf %212 : vector<4x14xf32> to vector<4x14xbf16>
    %c0_146 = arith.constant 0 : index
    %c1_147 = arith.constant 1 : index
    %214 = vector.load %arg13[%c0_146, %c1_147] : memref<4x16xbf16, #tpu.memory_space<vmem>>, vector<4x14xbf16>
    tpu.vector_store %arg13[%c0_146, %c1_147], %213 {strides = array<i32>} : memref<4x16xbf16, #tpu.memory_space<vmem>>, vector<4x14xbf16>,
    %215 = vector.extract_strided_slice %125 {offsets = [0, 0], sizes = [4, 1], strides = [1, 1]} : vector<4x16xf32> to vector<4x1xf32>
    %216 = vector.extract_strided_slice %125 {offsets = [0, 1], sizes = [4, 1], strides = [1, 1]} : vector<4x16xf32> to vector<4x1xf32>
    %217 = arith.maximumf %215, %216 : vector<4x1xf32>
    %218 = arith.truncf %217 : vector<4x1xf32> to vector<4x1xbf16>
    %c0_148 = arith.constant 0 : index
    %c0_149 = arith.constant 0 : index
    %219 = vector.load %arg13[%c0_148, %c0_149] : memref<4x16xbf16, #tpu.memory_space<vmem>>, vector<4x1xbf16>
    tpu.vector_store %arg13[%c0_148, %c0_149], %218 {strides = array<i32>} : memref<4x16xbf16, #tpu.memory_space<vmem>>, vector<4x1xbf16>,
    %220 = vector.extract_strided_slice %125 {offsets = [0, 14], sizes = [4, 1], strides = [1, 1]} : vector<4x16xf32> to vector<4x1xf32>
    %221 = vector.extract_strided_slice %125 {offsets = [0, 15], sizes = [4, 1], strides = [1, 1]} : vector<4x16xf32> to vector<4x1xf32>
    %222 = arith.maximumf %220, %221 : vector<4x1xf32>
    %223 = arith.truncf %222 : vector<4x1xf32> to vector<4x1xbf16>
    %c0_150 = arith.constant 0 : index
    %c15_151 = arith.constant 15 : index
    %224 = vector.load %arg13[%c0_150, %c15_151] : memref<4x16xbf16, #tpu.memory_space<vmem>>, vector<4x1xbf16>
    tpu.vector_store %arg13[%c0_150, %c15_151], %223 {strides = array<i32>} : memref<4x16xbf16, #tpu.memory_space<vmem>>, vector<4x1xbf16>,
    %c0_152 = arith.constant 0 : index
    %c0_153 = arith.constant 0 : index
    %225 = vector.load %arg13[%c0_152, %c0_153] : memref<4x16xbf16, #tpu.memory_space<vmem>>, vector<4x16xbf16>
    %cst_154 = arith.constant dense<0.000000e+00> : vector<8x16xf32>
    %226 = tpu.matmul %3, %225, %cst_154 {dimension_numbers = #tpu.dot_dimension_numbers<[1], [0], [0], [1], [0, 0, 1, 1], [], []>} : vector<8x4xbf16>, vector<4x16xbf16>, vector<8x16xf32> -> vector<8x16xf32>
    %227 = vector.broadcast %10 : vector<8x1xf32> to vector<8x16xf32>
    %228 = arith.addf %226, %227 : vector<8x16xf32>
    %cst_155 = arith.constant 0.000000e+00 : f32
    %229 = vector.broadcast %cst_155 : f32 to vector<8x16xf32>
    %230 = arith.cmpf oge, %228, %229 : vector<8x16xf32>
    %cst_156 = arith.constant 9.99999974E-5 : f32
    %231 = vector.broadcast %cst_156 : f32 to vector<8x16xf32>
    %232 = arith.mulf %231, %228 : vector<8x16xf32>
    %233 = arith.select %230, %228, %232 : vector<8x16xi1>, vector<8x16xf32>
    %c1_157 = arith.constant 1 : index
    %c24_158 = arith.constant 24 : index
    %c0_159 = arith.constant 0 : index
    %234 = vector.load %arg10[%c1_157, %c24_158, %c0_159] : memref<2x32x16xf32, #tpu.memory_space<vmem>>, vector<1x8x16xf32>
    %235 = vector.shape_cast %234 : vector<1x8x16xf32> to vector<8x16xf32>
    %236 = vector.shape_cast %233 : vector<8x16xf32> to vector<1x8x16xf32>
    tpu.vector_store %arg10[%c1_157, %c24_158, %c0_159], %236 {strides = array<i32>} : memref<2x32x16xf32, #tpu.memory_space<vmem>>, vector<1x8x16xf32>,
    return
  }
  func.func @transform_0(%arg0: i32) -> (i32, i32, i32) {
    %c0_i32 = arith.constant 0 : i32
    %c0_i32_0 = arith.constant 0 : i32
    %c0_i32_1 = arith.constant 0 : i32
    return %arg0, %c0_i32, %c0_i32_0 : i32, i32, i32
  }
  func.func @transform_1(%arg0: i32) -> (i32, i32) {
    %c0_i32 = arith.constant 0 : i32
    %c0_i32_0 = arith.constant 0 : i32
    %c0_i32_1 = arith.constant 0 : i32
    return %c0_i32, %c0_i32_0 : i32, i32
  }
  func.func @transform_2(%arg0: i32) -> (i32, i32) {
    %c0_i32 = arith.constant 0 : i32
    %c0_i32_0 = arith.constant 0 : i32
    %c0_i32_1 = arith.constant 0 : i32
    return %c0_i32, %c0_i32_0 : i32, i32
  }
  func.func @transform_3(%arg0: i32) -> (i32, i32) {
    %c0_i32 = arith.constant 0 : i32
    %c0_i32_0 = arith.constant 0 : i32
    %c0_i32_1 = arith.constant 0 : i32
    return %c0_i32, %c0_i32_0 : i32, i32
  }
  func.func @transform_4(%arg0: i32) -> (i32, i32) {
    %c0_i32 = arith.constant 0 : i32
    %c0_i32_0 = arith.constant 0 : i32
    %c0_i32_1 = arith.constant 0 : i32
    return %c0_i32, %c0_i32_0 : i32, i32
  }
  func.func @transform_5(%arg0: i32) -> (i32, i32) {
    %c0_i32 = arith.constant 0 : i32
    %c0_i32_0 = arith.constant 0 : i32
    %c0_i32_1 = arith.constant 0 : i32
    return %c0_i32, %c0_i32_0 : i32, i32
  }
  func.func @transform_6(%arg0: i32) -> (i32, i32) {
    %c0_i32 = arith.constant 0 : i32
    %c0_i32_0 = arith.constant 0 : i32
    %c0_i32_1 = arith.constant 0 : i32
    return %c0_i32, %c0_i32_0 : i32, i32
  }
  func.func @transform_7(%arg0: i32) -> (i32, i32) {
    %c0_i32 = arith.constant 0 : i32
    %c0_i32_0 = arith.constant 0 : i32
    %c0_i32_1 = arith.constant 0 : i32
    return %c0_i32, %c0_i32_0 : i32, i32
  }
  func.func @transform_8(%arg0: i32) -> (i32, i32) {
    %c0_i32 = arith.constant 0 : i32
    %c0_i32_0 = arith.constant 0 : i32
    %c0_i32_1 = arith.constant 0 : i32
    return %c0_i32, %c0_i32_0 : i32, i32
  }
  func.func @transform_9(%arg0: i32) -> (i32, i32, i32) {
    %c0_i32 = arith.constant 0 : i32
    %c0_i32_0 = arith.constant 0 : i32
    %c0_i32_1 = arith.constant 0 : i32
    return %arg0, %c0_i32, %c0_i32_0 : i32, i32, i32
  }
}

</mosaic_0001>

<bundles_post_ra>
// kernel: tpu_custom_call.1
= control target key start
LH: loop header
LB: loop body
LE: loop exit
PB: predicated region body
PF: predicated region fallthrough
CT: control target
= control target key end

     0   :  { %vm1258_vm0 = vcmask 1041408   ;;  %vm70_vm1 = vcmask 31744   ;;  %v929_v1 = vmov 0   ;;  %v930_v7 = vmov 1   ;;  %s933_s17 = smov 2   ;;  %s934_s20 = smov 1   ;;  %s1245_s0 = inlined_call_operand.vmem [shape: f32[2,4,16], index: 0, kind: input, shape index: {}]   ;;  %s1246_s1 = inlined_call_operand.vmem [shape: bf16[24,4], index: 1, kind: input, shape index: {}]   ;;  %s1247_s2 = inlined_call_operand.vmem [shape: f32[24,2], index: 2, kind: input, shape index: {}]   ;;  %s1248_s5 = inlined_call_operand.vmem [shape: bf16[8,40], index: 5, kind: input, shape index: {}]   ;;  %s1249_s3 = inlined_call_operand.vmem [shape: bf16[8,24], index: 3, kind: input, shape index: {}]   ;;  %s1250_s7 = inlined_call_operand.vmem [shape: bf16[8,4], index: 7, kind: input, shape index: {}]   ;;  %s1251_s4 = inlined_call_operand.vmem [shape: f32[8,1], index: 4, kind: input, shape index: {}]   ;;  %s1252_s6 = inlined_call_operand.vmem [shape: f32[8,3], index: 6, kind: input, shape index: {}]   ;;  %s1253_s8 = inlined_call_operand.vmem [shape: f32[8,1], index: 8, kind: input, shape index: {}]   ;;  %s1254_s9 = inlined_call_operand.vmem [shape: f32[2,32,16], index: 9, kind: output, shape index: {}]  }
   0x1   :  { %v992_v0 = vld [vmem:[%s1245_s0] sm:$0xf]  ;;  %909 = vset.pattern.permute.xlu0 %v929_v1  ;;  %911 = vset.pattern.permute.xlu1 %v929_v1  ;;  %v41_v4 = vld [vmem:[%s1247_s2 + $0x10] sm:$0xff]  ;;  %v1011_v6 = vld [vmem:[%s1246_s1 + $0x8] ss:$0 sps:$4 sm:$0xff]   ;;  %vm170_vm3 = vcmask 125952   ;;  %v373_v34 = vlaneseq }
   0x2   :  { %v46_v2 = vpack.c.bf16 %v992_v0, %v992_v0  ;;  %v1001_v3 = vld [vmem:[%s1246_s1] sm:$0xff]   ;;  %59 = vperm.xlu0 %909, %v41_v4   ;;  %v931_v17 = vmov 0.0   ;;  %s932_s1 = smov 126   ;;  %v40_v19 = vld [vmem:[%s1247_s2 + $0x8] sm:$0xff]  ;;  %s935_s21 = smov 127   ;;  %vm936_vm4 = vmmov 0  }
   0x3   :  { %839 = vmatprep.mubr.msk.bf16.mxu0 %vm70_vm1, %v1001_v3  ;;  %843 = vmatprep.subr.bf16.mxu1 %v931_v17  ;;  %v1043_v20 = vld [vmem:[%s1245_s0 + $0x4] sm:$0xf]  ;;  %vm182_vm5 = vcmask 109568   ;;  %vm159_vm6 = vcmask 125968   ;;  %vm184_vm7 = vcmask 126064   ;;  %vm161_vm8 = vcmask 11264  }
   0x4   :  { %897 = vmatprep.subr.msk.bf16.mxu0 %vm1258_vm0, %v46_v2  ;;  %v79_v5 = vsel %vm1258_vm0, %v46_v2, 0  ;;  %847 = vmatprep.mubr.msk.bf16.mxu1 %vm936_vm4, %v931_v17  ;;  %vm166_vm9 = vcmask 125960   ;;  %vm168_vm10 = vcmask 3072   ;;  %vm175_vm11 = vcmask 117760   ;;  %v1076_v30 = vld [vmem:[%s1248_s5] sm:$0xf] }
   0x5   :  { %838 = vmatpush3.bf16.msra.mxu0 %v79_v5  ;;  %vm177_vm12 = vcmask 126072   ;;  %vm1257_vm13 = vcmask 1043456   ;;  %v456_v29 = vpack.c.bf16 %v1043_v20, %v1043_v20  ;;  %vm1255_vm14 = vcmask 326656  }
   0x6   :  { %910 = vset.pattern.permute.xlu0 %v930_v7  ;;  %851 = vmatprep.subr.bf16.mxu0 %v931_v17  ;;  %v937_v32 = vmov 1983009808   ;;  %v374_v40 = vshrl.u32 %v373_v34, 7 }
   0x7   :  { %141 = vperm.xlu0 %910, %v41_v4   ;;  %v458_v31 = vsel %vm1258_vm0, %v456_v29, 0  ;;  %v371_v33 = vunpack.c.l.s4 %v937_v32  ;;  %v44_v32 = vld [vmem:[%s1253_s8] sm:$0xff] }
   0x8   :  { %840 = vmatmul.mubr.msk.bf16.vlgmr.msra.gmra.mrb[0].mxu0 %vm70_vm1, %v1011_v6 }
   0x9   :  { %857 = vmatprep.mubr.msk.bf16.mxu0 %vm936_vm4, %v931_v17  ;;  %v372_v39 = vunpack.c.0.s8 %v371_v33 }
   0xb   :  { %v1093_v46 = vsub.s32 %v372_v39, %v374_v40 }
  0x81   :  { %v1018_v8 = vpop.permute.xlu0 %59 }
  0x86   :  { %v1020_v10 = vpop.permute.xlu0 %141 }
  0xdb   :  { %v841_v9 = vpop.f32.mrb[0].mxu0 }
  0xdc   :  { %v124_v11 = vadd.f32 %v841_v9, %v1018_v8  ;;  %v1023_v12 = vpop.f32.mrb[1].mxu0 }
  0xdd   :  { %v842_v13 = vpop.f32.mrb[2].mxu0 }
  0xde   :  { %vm131_vm2 = vcmp.ge.f32.partialorder %v124_v11, 0.0  ;;  %v146_v14 = vmul.f32 %v1020_v10, %v124_v11  ;;  %v1026_v15 = vpop.f32.mrb[3].mxu0 }
  0xe0   :  { %v149_v16 = vsel %vm131_vm2, %v124_v11, %v146_v14  ;;  %vm380_vm2 = vcmask 115720  }
  0xe1   :  { %v152_v18 = vpack.c.bf16 %v149_v16, %v149_v16 }
  0xe3   :  { %171 = vst.msk [vmem:[#allocation3 + $0x8] sm:$0xf] %vm170_vm3, %v152_v18  ;;  %179 = vrot.lane.b32.xlu0 %v152_v18, %s932_s1  ;;  %156 = vrot.lane.b32.xlu1 %v152_v18, %s933_s17 }
  0xe7   :  { %137 = vperm.xlu0 %910, %v40_v19   ;;  %163 = vrot.lane.b32.xlu1 %v152_v18, %s934_s20 }
  0xeb   :  { %172 = vrot.lane.b32.xlu1 %v152_v18, %s935_s21  ;;  %364 = vrot.lane.b32.xlu0 %v992_v0, %s932_s1 }
  0xec   :  { %912 = vset.pattern.permute.xlu0 %v929_v1 }
  0xef   :  { %54 = vperm.xlu1 %911, %v40_v19   ;;  %695 = vrot.lane.b32.xlu0 %v1043_v20, %s932_s1  ;;  %v1140_v19 = vld [vmem:[%s1250_s7] sm:$0xf] }
  0xf3   :  { %360 = vrot.lane.b32.xlu1 %v992_v0, %s935_s21 }
  0xf7   :  { %691 = vrot.lane.b32.xlu1 %v1043_v20, %s935_s21 }
 0x155   :  { %v180_v21 = vpop.permute.xlu0 %179  ;;  %v157_v22 = vpop.permute.xlu1 %156 }
 0x156   :  { %183 = vst.msk [vmem:[#allocation3 + $0x10] sm:$0xf] %vm182_vm5, %v180_v21 }
 0x157   :  { %160 = vst.msk [vmem:[#allocation3] sm:$0xf] %vm159_vm6, %v157_v22 }
 0x158   :  { %185 = vst.msk [vmem:[#allocation3 + $0x10] sm:$0xf] %vm184_vm7, %v929_v1 }
 0x159   :  { %162 = vst.msk [vmem:[#allocation3] sm:$0xf] %vm161_vm8, %v929_v1  ;;  %v164_v23 = vpop.permute.xlu1 %163 }
 0x15a   :  { %167 = vst.msk [vmem:[#allocation3 + $0x4] sm:$0xf] %vm166_vm9, %v164_v23 }
 0x15b   :  { %169 = vst.msk [vmem:[#allocation3 + $0x4] sm:$0xf] %vm168_vm10, %v929_v1 }
 0x15d   :  { %v173_v24 = vpop.permute.xlu1 %172 }
 0x15e   :  { %176 = vst.msk [vmem:[#allocation3 + $0xc] sm:$0xf] %vm175_vm11, %v173_v24 }
 0x15f   :  { %178 = vst.msk [vmem:[#allocation3 + $0xc] sm:$0xf] %vm177_vm12, %v929_v1  ;;  %v921_v26 = vld [vmem:[#allocation3 + $0x10] ss:$0 sps:$4 sm:$0xff]  }
 0x160   :  { %v300_v28 = vsel %vm1257_vm13, %v921_v26, 0 }
 0x162   :  { %v919_v25 = vld [vmem:[#allocation3] sm:$0xff]  }
 0x163   :  { %852 = vmatpush3.bf16.msra.mxu0 %v919_v25 }
 0x164   :  { %853 = vmatprep.subr.bf16.mxu0 %v931_v17 }
 0x166   :  { %v920_v27 = vld [vmem:[#allocation3 + $0x8] sm:$0xff]   ;;  %v1080_v35 = vpop.permute.xlu0 %137 }
 0x167   :  { %854 = vmatpush3.bf16.msra.mxu0 %v920_v27  ;;  %v42_v27 = vld [vmem:[%s1251_s4] sm:$0xff] }
 0x168   :  { %855 = vmatprep.subr.bf16.mxu0 %v931_v17 }
 0x16a   :  { %v365_v42 = vpop.permute.xlu0 %364 }
 0x16b   :  { %856 = vmatpush3.bf16.msra.mxu0 %v300_v28  ;;  %v43_v28 = vld [vmem:[%s1252_s6] sm:$0xff] }
 0x16c   :  { %898 = vmatprep.subr.msk.bf16.mxu0 %vm1258_vm0, %v456_v29  ;;  %v39_v29 = vld [vmem:[%s1247_s2] sm:$0xff] }
 0x16e   :  { %v1082_v36 = vpop.permute.xlu1 %54  ;;  %858 = vmatmul.mubr.msk.bf16.vlgmr.msra.gmra.mrb[4].mxu0 %vm1255_vm14, %v1076_v30  ;;  %v696_v52 = vpop.permute.xlu0 %695  ;;  %vm396_vm14 = vcmask 124024  }
 0x16f   :  { %v119_v37 = vadd.f32 %v1026_v15, %v1082_v36  ;;  %868 = vmatpush3.bf16.msra.mxu0 %v458_v31  ;;  %869 = vmatprep.mubr.msk.bf16.mxu0 %vm70_vm1, %v1001_v3  ;;  %v1123_v3 = vld [vmem:[%s1249_s3] sm:$0xf]  ;;  %v938_v31 = vmov 2  }
 0x170   :  { %881 = vmatprep.subr.bf16.mxu0 %v931_v17 }
 0x171   :  { %vm130_vm15 = vcmp.ge.f32.partialorder %v119_v37, 0.0  ;;  %v145_v38 = vmul.f32 %v1080_v35, %v119_v37 }
 0x172   :  { %v361_v41 = vpop.permute.xlu1 %360 }
 0x173   :  { %v148_v43 = vsel %vm130_vm15, %v119_v37, %v145_v38  ;;  %v363_v44 = vmax.f32 %v992_v0, %v361_v41  ;;  %vm1256_vm15 = vcmask 1024  }
 0x174   :  { %v186_v45 = vpack.c.bf16 %v148_v43, %v148_v43 }
 0x175   :  { %v367_v47 = vmax.f32 %v363_v44, %v365_v42  ;;  %v382_v50 = vpack.c.bf16 %v363_v44, %v363_v44 }
 0x176   :  { %196 = vrot.lane.b32.xlu0 %v186_v45, %s935_s21  ;;  %195 = vst.msk [vmem:[#allocation2 + $0x4] sm:$0xf] %vm170_vm3, %v186_v45  ;;  %190 = vrot.lane.b32.xlu1 %v186_v45, %s934_s20  ;;  %v692_v53 = vpop.permute.xlu1 %691 }
 0x177   :  { %870 = vmatmul.mubr.msk.bf16.vlgmr.msra.gmra.mrb[8].mxu0 %vm70_vm1, %v1011_v6  ;;  %v368_v48 = vpack.c.bf16 %v367_v47, %v367_v47  ;;  %v392_v51 = vrot.slane %v382_v50, %v1093_v46  ;;  %v694_v15 = vmax.f32 %v1043_v20, %v692_v53 }
 0x178   :  { %887 = vmatprep.mubr.msk.bf16.mxu0 %vm936_vm4, %v931_v17 }
 0x179   :  { %v376_v49 = vrot.slane %v368_v48, %v1093_v46  ;;  %v712_v24 = vpack.c.bf16 %v694_v15, %v694_v15 }
 0x17a   :  { %393 = vrot.lane.b32.xlu0 %v392_v51, %s934_s20 }
 0x17b   :  { %377 = vrot.lane.b32.xlu1 %v376_v49, %s934_s20  ;;  %v721_v25 = vrot.slane %v712_v24, %v1093_v46 }
 0x1e8   :  { %v197_v54 = vpop.permute.xlu0 %196  ;;  %v191_v55 = vpop.permute.xlu1 %190 }
 0x1e9   :  { %199 = vst.msk [vmem:[#allocation2 + $0x8] sm:$0xf] %vm175_vm11, %v197_v54 }
 0x1ea   :  { %193 = vst.msk [vmem:[#allocation2] sm:$0xf] %vm166_vm9, %v191_v55 }
 0x1eb   :  { %200 = vst.msk [vmem:[#allocation2 + $0x8] sm:$0xf] %vm177_vm12, %v929_v1 }
 0x1ec   :  { %194 = vst.msk [vmem:[#allocation2] sm:$0xf] %vm168_vm10, %v929_v1  ;;  %v394_v58 = vpop.permute.xlu0 %393 }
 0x1ed   :  { %v378_v56 = vpop.permute.xlu1 %377 }
 0x1ee   :  { %381 = vst.msk [vmem:[#allocation4] sm:$0x3] %vm380_vm2, %v378_v56 }
 0x1ef   :  { %384 = vst.msk [vmem:[#allocation4] sm:$0x3] %vm1256_vm15, %v382_v50  ;;  %vm218_vm15 = vcmask 195584  }
 0x1f0   :  { %397 = vst.msk [vmem:[#allocation4] sm:$0x3] %vm396_vm14, %v394_v58 }
 0x1f2   :  { %v923_v59 = vld [vmem:[#allocation2 + $0x8] ss:$0 sps:$4 sm:$0xff]  }
 0x1f3   :  { %v922_v57 = vld [vmem:[#allocation2] sm:$0xff]   ;;  %v224_v62 = vsel %vm1257_vm13, %v923_v59, 0 }
 0x1f4   :  { %844 = vmatpush3.bf16.msra.mxu1 %v922_v57 }
 0x1f5   :  { %845 = vmatprep.subr.bf16.mxu1 %v931_v17 }
 0x1f7   :  { %v398_v2 = vld [vmem:[#allocation4] sm:$0x3] }
 0x1f8   :  { %846 = vmatpush3.bf16.msra.mxu1 %v224_v62  ;;  %v408_v4 = vsel %vm1258_vm0, %v398_v2, 0 }
 0x1f9   :  { %861 = vmatprep.subr.bf16.mxu1 %v931_v17 }
 0x1fb   :  { %848 = vmatmul.mubr.msk.bf16.vlgmr.msra.gmra.mrb[0].mxu1 %vm218_vm15, %v1123_v3 }
 0x1fc   :  { %862 = vmatpush3.bf16.msra.mxu1 %v408_v4  ;;  %863 = vmatprep.mubr.msk.bf16.mxu1 %vm936_vm4, %v931_v17 }
 0x1fd   :  { %873 = vmatprep.subr.bf16.mxu1 %v931_v17 }
 0x203   :  { %864 = vmatmul.mubr.msk.bf16.vlgmr.msra.gmra.mrb[4].mxu1 %vm70_vm1, %v1140_v19 }
 0x204   :  { %877 = vmatprep.mubr.msk.bf16.mxu1 %vm936_vm4, %v931_v17 }
 0x241   :  { %v1116_v60 = vpop.f32.mrb[4].mxu0 }
 0x242   :  { %v859_v61 = vpop.f32.mrb[5].mxu0 }
 0x243   :  { %v339_v63 = vpop.f32.mrb[6].mxu0 }
 0x244   :  { %v860_v0 = vpop.f32.mrb[7].mxu0 }
 0x24a   :  { %v871_v5 = vpop.f32.mrb[8].mxu0 }
 0x24b   :  { %v503_v6 = vadd.f32 %v871_v5, %v1018_v8  ;;  %v1132_v9 = vpop.f32.mrb[9].mxu0 }
 0x24c   :  { %v872_v11 = vpop.f32.mrb[10].mxu0 }
 0x24d   :  { %vm510_vm13 = vcmp.ge.f32.partialorder %v503_v6, 0.0  ;;  %v513_v13 = vmul.f32 %v503_v6, %v1020_v10  ;;  %v497_v14 = vpop.f32.mrb[11].mxu0  ;;  %v698_v10 = vmax.f32 %v694_v15, %v696_v52 }
 0x24e   :  { %v498_v16 = vadd.f32 %v497_v14, %v1082_v36 }
 0x24f   :  { %v516_v18 = vsel %vm510_vm13, %v503_v6, %v513_v13  ;;  %v699_v23 = vpack.c.bf16 %v698_v10, %v698_v10 }
 0x250   :  { %v519_v21 = vpack.c.bf16 %v516_v18, %v516_v18  ;;  %vm509_vm0 = vcmp.ge.f32.partialorder %v498_v16, 0.0  ;;  %v512_v8 = vmul.f32 %v498_v16, %v1080_v35 }
 0x251   :  { %v707_v26 = vrot.slane %v699_v23, %v1093_v46 }
 0x252   :  { %533 = vst.msk [vmem:[#allocation3 + $0x8] sm:$0xf] %vm170_vm3, %v519_v21  ;;  %523 = vrot.lane.b32.xlu0 %v519_v21, %s933_s17  ;;  %528 = vrot.lane.b32.xlu1 %v519_v21, %s934_s20  ;;  %v515_v20 = vsel %vm509_vm0, %v498_v16, %v512_v8  ;;  %vm1259_vm0 = vcmask 1024  }
 0x253   :  { %v544_v22 = vpack.c.bf16 %v515_v20, %v515_v20 }
 0x255   :  { %553 = vst.msk [vmem:[#allocation2 + $0x4] sm:$0xf] %vm170_vm3, %v544_v22  ;;  %vm1260_vm3 = vcmask 1043456  }
 0x256   :  { %534 = vrot.lane.b32.xlu0 %v519_v21, %s935_s21  ;;  %548 = vrot.lane.b32.xlu1 %v544_v22, %s934_s20 }
 0x25a   :  { %539 = vrot.lane.b32.xlu0 %v519_v21, %s932_s1  ;;  %554 = vrot.lane.b32.xlu1 %v544_v22, %s935_s21 }
 0x25e   :  { %722 = vrot.lane.b32.xlu0 %v721_v25, %s934_s20  ;;  %708 = vrot.lane.b32.xlu1 %v707_v26, %s934_s20 }
 0x262   :  { %206 = vperm.xlu0 %912, %v42_v27   ;;  %277 = vperm.xlu1 %911, %v43_v28  }
 0x266   :  { %913 = vset.pattern.permute.xlu0 %v930_v7  ;;  %49 = vperm.xlu1 %911, %v39_v29  }
 0x267   :  { %346 = vperm.xlu0 %913, %v43_v28  }
 0x26a   :  { %914 = vset.pattern.permute.xlu1 %v938_v31 }
 0x26b   :  { %133 = vperm.xlu0 %913, %v39_v29   ;;  %351 = vperm.xlu1 %914, %v43_v28  }
 0x26f   :  { %915 = vset.pattern.permute.xlu1 %v929_v1  ;;  %916 = vset.pattern.permute.xlu0 %v929_v1 }
 0x270   :  { %401 = vperm.xlu1 %915, %v44_v32  }
 0x2c4   :  { %v524_v33 = vpop.permute.xlu0 %523  ;;  %v529_v34 = vpop.permute.xlu1 %528 }
 0x2c5   :  { %526 = vst.msk [vmem:[#allocation3] sm:$0xf] %vm159_vm6, %v524_v33  ;;  %vm1262_vm6 = vcmask 1041408  }
 0x2c6   :  { %531 = vst.msk [vmem:[#allocation3 + $0x4] sm:$0xf] %vm166_vm9, %v529_v34 }
 0x2c7   :  { %527 = vst.msk [vmem:[#allocation3] sm:$0xf] %vm161_vm8, %v929_v1 }
 0x2c8   :  { %532 = vst.msk [vmem:[#allocation3 + $0x4] sm:$0xf] %vm168_vm10, %v929_v1  ;;  %v535_v7 = vpop.permute.xlu0 %534  ;;  %v549_v35 = vpop.permute.xlu1 %548 }
 0x2c9   :  { %537 = vst.msk [vmem:[#allocation3 + $0xc] sm:$0xf] %vm175_vm11, %v535_v7 }
 0x2ca   :  { %551 = vst.msk [vmem:[#allocation2] sm:$0xf] %vm166_vm9, %v549_v35 }
 0x2cb   :  { %538 = vst.msk [vmem:[#allocation3 + $0xc] sm:$0xf] %vm177_vm12, %v929_v1 }
 0x2cc   :  { %552 = vst.msk [vmem:[#allocation2] sm:$0xf] %vm168_vm10, %v929_v1  ;;  %v540_v36 = vpop.permute.xlu0 %539  ;;  %v555_v37 = vpop.permute.xlu1 %554 }
 0x2cd   :  { %542 = vst.msk [vmem:[#allocation3 + $0x10] sm:$0xf] %vm182_vm5, %v540_v36  ;;  %vm1261_vm5 = vmmov %vm1260_vm3 }
 0x2ce   :  { %557 = vst.msk [vmem:[#allocation2 + $0x8] sm:$0xf] %vm175_vm11, %v555_v37  ;;  %v260_v0 = vpop.f32.mrb[0].mxu1 }
 0x2cf   :  { %v924_v38 = vld [vmem:[#allocation3] sm:$0xff]   ;;  %543 = vst.msk [vmem:[#allocation3 + $0x10] sm:$0xf] %vm184_vm7, %v929_v1  ;;  %vm1263_vm7 = vcmask 326656  }
 0x2d0   :  { %558 = vst.msk [vmem:[#allocation2 + $0x8] sm:$0xf] %vm177_vm12, %v929_v1  ;;  %882 = vmatpush3.bf16.msra.mxu0 %v924_v38  ;;  %v723_v39 = vpop.permute.xlu0 %722  ;;  %v709_v40 = vpop.permute.xlu1 %708 }
 0x2d1   :  { %883 = vmatprep.subr.bf16.mxu0 %v931_v17  ;;  %711 = vst.msk [vmem:[#allocation4] sm:$0x3] %vm380_vm2, %v709_v40 }
 0x2d2   :  { %713 = vst.msk [vmem:[#allocation4] sm:$0x3] %vm1259_vm0, %v712_v24  ;;  %v926_v42 = vld [vmem:[#allocation3 + $0x8] sm:$0xff]  }
 0x2d3   :  { %v925_v41 = vld [vmem:[#allocation2] sm:$0xff]   ;;  %725 = vst.msk [vmem:[#allocation4] sm:$0x3] %vm396_vm14, %v723_v39 }
 0x2d4   :  { %874 = vmatpush3.bf16.msra.mxu1 %v925_v41  ;;  %884 = vmatpush3.bf16.msra.mxu0 %v926_v42 }
 0x2d5   :  { %875 = vmatprep.subr.bf16.mxu1 %v931_v17  ;;  %885 = vmatprep.subr.bf16.mxu0 %v931_v17 }
 0x2d6   :  { %v928_v43 = vld [vmem:[#allocation3 + $0x10] ss:$0 sps:$4 sm:$0xff]  }
 0x2d7   :  { %v927_v1 = vld [vmem:[#allocation2 + $0x8] ss:$0 sps:$4 sm:$0xff]   ;;  %v639_v45 = vsel %vm1261_vm5, %v928_v43, 0 }
 0x2d8   :  { %v572_v44 = vsel %vm1260_vm3, %v927_v1, 0  ;;  %886 = vmatpush3.bf16.msra.mxu0 %v639_v45 }
 0x2d9   :  { %876 = vmatpush3.bf16.msra.mxu1 %v572_v44 }
 0x2da   :  { %891 = vmatprep.subr.bf16.mxu1 %v931_v17  ;;  %v726_v46 = vld [vmem:[#allocation4] sm:$0x3] }
 0x2db   :  { %v728_v47 = vsel %vm1262_vm6, %v726_v46, 0  ;;  %888 = vmatmul.mubr.msk.bf16.vlgmr.msra.gmra.mrb[12].mxu0 %vm1263_vm7, %v1076_v30 }
 0x2dc   :  { %878 = vmatmul.mubr.msk.bf16.vlgmr.msra.gmra.mrb[8].mxu1 %vm218_vm15, %v1123_v3  ;;  %v849_v3 = vpop.f32.mrb[1].mxu1 }
 0x2dd   :  { %892 = vmatpush3.bf16.msra.mxu1 %v728_v47  ;;  %893 = vmatprep.mubr.msk.bf16.mxu1 %vm936_vm4, %v931_v17  ;;  %vm150_vm4 = vcmask 130048   ;;  %v263_v4 = vpop.f32.mrb[2].mxu1 }
 0x2de   :  { %v850_v6 = vpop.f32.mrb[3].mxu1 }
 0x2df   :  { %v444_v13 = vpop.f32.mrb[4].mxu1 }
 0x2e0   :  { %v865_v15 = vpop.f32.mrb[5].mxu1 }
 0x2e1   :  { %v278_v48 = vpop.permute.xlu1 %277  ;;  %v207_v49 = vpop.permute.xlu0 %206 }
 0x2e2   :  { %v337_v50 = vadd.f32 %v1116_v60, %v278_v48  ;;  %v261_v2 = vadd.f32 %v260_v0, %v207_v49  ;;  %v447_v16 = vpop.f32.mrb[6].mxu1 }
 0x2e4   :  { %894 = vmatmul.mubr.msk.bf16.vlgmr.msra.gmra.mrb[12].mxu1 %vm70_vm1, %v1140_v19  ;;  %v343_v51 = vmul.f32 0.01, %v337_v50  ;;  %vm342_vm8 = vcmp.ge.f32.partialorder %v337_v50, 0.0  ;;  %vm266_vm11 = vcmp.ge.f32.partialorder %v261_v2, 0.0  ;;  %v267_v5 = vmul.f32 0.0001, %v261_v2 }
 0x2e5   :  { %v50_v52 = vpop.permute.xlu1 %49  ;;  %v866_v19 = vpop.f32.mrb[7].mxu1 }
 0x2e6   :  { %v347_v53 = vpop.permute.xlu0 %346  ;;  %v344_v54 = vsel %vm342_vm8, %v337_v50, %v343_v51  ;;  %v116_v55 = vadd.f32 %v1023_v12, %v50_v52  ;;  %v495_v30 = vadd.f32 %v1132_v9, %v50_v52  ;;  %v268_v9 = vsel %vm266_vm11, %v261_v2, %v267_v5 }
 0x2e7   :  { %v349_v56 = vmul.f32 %v347_v53, %v344_v54  ;;  %269 = vst.msk [vmem:[%s1254_s9 + $0x8] sm:$0xff] %vm150_vm4, %v268_v9 }
 0x2e8   :  { %vm129_vm9 = vcmp.ge.f32.partialorder %v116_v55, 0.0  ;;  %vm508_vm10 = vcmp.ge.f32.partialorder %v495_v30, 0.0 }
 0x2ea   :  { %v134_v57 = vpop.permute.xlu0 %133  ;;  %v352_v58 = vpop.permute.xlu1 %351 }
 0x2eb   :  { %v144_v17 = vmul.f32 %v134_v57, %v116_v55  ;;  %v511_v59 = vmul.f32 %v495_v30, %v134_v57  ;;  %v354_v61 = vadd.f32 %v352_v58, %v349_v56 }
 0x2ed   :  { %v147_v60 = vsel %vm129_vm9, %v116_v55, %v144_v17  ;;  %v514_v62 = vsel %vm508_vm10, %v495_v30, %v511_v59  ;;  %vm355_vm1 = vcmp.ge.f32.partialorder %v354_v61, 0.0  ;;  %v356_v63 = vmul.f32 0.0001, %v354_v61 }
 0x2ee   :  { %151 = vst.msk [vmem:[%s1254_s9] sm:$0xff] %vm150_vm4, %v147_v60  ;;  %795 = vst.msk [vmem:[%s1254_s9 + $0x20] sm:$0xff] %vm150_vm4, %v514_v62 }
 0x2ef   :  { %v357_v12 = vsel %vm355_vm1, %v354_v61, %v356_v63  ;;  %v402_v11 = vpop.permute.xlu1 %401 }
 0x2f0   :  { %358 = vst.msk [vmem:[%s1254_s9 + $0x10] sm:$0xff] %vm150_vm4, %v357_v12  ;;  %v445_v14 = vadd.f32 %v444_v13, %v402_v11 }
 0x2f2   :  { %vm450_vm12 = vcmp.ge.f32.partialorder %v445_v14, 0.0  ;;  %v451_v18 = vmul.f32 0.0001, %v445_v14 }
 0x2f4   :  { %v452_v21 = vsel %vm450_vm12, %v445_v14, %v451_v18 }
 0x2f5   :  { %453 = vst.msk [vmem:[%s1254_s9 + $0x18] sm:$0xff] %vm150_vm4, %v452_v21 }
 0x3ae   :  { %v675_v20 = vpop.f32.mrb[12].mxu0 }
 0x3af   :  { %v608_v8 = vpop.f32.mrb[8].mxu1  ;;  %v676_v23 = vadd.f32 %v675_v20, %v278_v48  ;;  %v889_v24 = vpop.f32.mrb[13].mxu0 }
 0x3b0   :  { %v609_v10 = vadd.f32 %v608_v8, %v207_v49  ;;  %v879_v22 = vpop.f32.mrb[9].mxu1  ;;  %v678_v27 = vpop.f32.mrb[14].mxu0 }
 0x3b1   :  { %v611_v25 = vpop.f32.mrb[10].mxu1  ;;  %vm681_vm14 = vcmp.ge.f32.partialorder %v676_v23, 0.0  ;;  %v682_v29 = vmul.f32 0.01, %v676_v23  ;;  %v890_v31 = vpop.f32.mrb[15].mxu0 }
 0x3b2   :  { %vm614_vm13 = vcmp.ge.f32.partialorder %v609_v10, 0.0  ;;  %v615_v26 = vmul.f32 0.0001, %v609_v10  ;;  %v880_v28 = vpop.f32.mrb[11].mxu1 }
 0x3b3   :  { %v683_v33 = vsel %vm681_vm14, %v676_v23, %v682_v29 }
 0x3b4   :  { %v616_v32 = vsel %vm614_vm13, %v609_v10, %v615_v26  ;;  %v684_v34 = vmul.f32 %v683_v33, %v347_v53 }
 0x3b5   :  { %801 = vst.msk [vmem:[%s1254_s9 + $0x28] sm:$0xff] %vm150_vm4, %v616_v32 }
 0x3b6   :  { %v685_v35 = vadd.f32 %v684_v34, %v352_v58 }
 0x3b7   :  { %v764_v7 = vpop.f32.mrb[12].mxu1 }
 0x3b8   :  { %v765_v36 = vadd.f32 %v764_v7, %v402_v11  ;;  %v895_v37 = vpop.f32.mrb[13].mxu1  ;;  %vm686_vm2 = vcmp.ge.f32.partialorder %v685_v35, 0.0  ;;  %v687_v39 = vmul.f32 0.0001, %v685_v35 }
 0x3b9   :  { %v767_v38 = vpop.f32.mrb[14].mxu1 }
 0x3ba   :  { %vm770_vm15 = vcmp.ge.f32.partialorder %v765_v36, 0.0  ;;  %v771_v40 = vmul.f32 0.0001, %v765_v36  ;;  %v896_v41 = vpop.f32.mrb[15].mxu1  ;;  %v688_v42 = vsel %vm686_vm2, %v685_v35, %v687_v39 }
 0x3bb   :  { %806 = vst.msk [vmem:[%s1254_s9 + $0x30] sm:$0xff] %vm150_vm4, %v688_v42 }
 0x3bc   :  { %v772_v1 = vsel %vm770_vm15, %v765_v36, %v771_v40 }
 0x3bd   :  { %808 = vst.msk [vmem:[%s1254_s9 + $0x38] sm:$0xff] %vm150_vm4, %v772_v1 }

</bundles_post_ra>
